<compile_context>
chip_gen: v5e
topology: v5e:2x2
jax: 0.10.0
libtpu: 0.0.40
codegen_flags: <defaults>
</compile_context>

<pallas_src>
import functools

import jax
import jax.numpy as jnp
from jax import lax
from jax.experimental import pallas as pl
from jax.experimental.pallas import tpu as pltpu

MATMUL_DTYPE = jnp.bfloat16   # MXU operand dtype (accumulation stays f32)
LN_EPS = 1e-5
ROW_TILE_E = 2048             # max edge rows per edge-kernel grid step
ROW_TILE_N = 2048             # max node rows per node-kernel grid step
MAX_SCATTER_CHUNK = 512       # max edge rows per in-kernel scatter chunk


# ----------------------------------------------------------------------------
# small helpers
# ----------------------------------------------------------------------------
def _cdiv(a, b):
    return -(-a // b)


def _round_up(n, m):
    return _cdiv(n, m) * m


def _vmem_limit_bytes():
    # 128 MiB physical VMEM on v5e/v6e, 64 MiB per TensorCore on v7x.
    cap = 64 * 1024 * 1024            # conservative default (v7x-sized)
    try:
        cap = int(pltpu.get_tpu_info().vmem_capacity_bytes)
    except Exception:
        pass
    return min((cap * 3) // 4, 96 * 1024 * 1024)   # 96 MiB v5e/v6e, 48 MiB v7x


VMEM_LIMIT = _vmem_limit_bytes()


def _edge_tiles(rows, max_tile=ROW_TILE_E):
    """Edge row tile (multiple of 128 -> lane-aligned chunking) + padded rows.
    Padding waste is bounded to < 128 rows per tile (no 70%-padding blowups)."""
    r = _round_up(rows, 128)
    nt = _cdiv(r, max_tile)
    tile = _round_up(_cdiv(r, nt), 128)
    return tile, tile * nt


def _node_tiles(rows, max_tile=ROW_TILE_N):
    """Node row tile (multiple of 8) + padded rows; keep >=2 tiles when there
    are enough rows so the v7x megacore's second TensorCore gets work."""
    r = _round_up(rows, 8)
    nt = _cdiv(r, max_tile)
    if r >= 16:
        nt = max(nt, 2)
    tile = _round_up(_cdiv(r, nt), 8)
    return tile, tile * nt


def _scatter_chunk(e_pad, max_chunk=MAX_SCATTER_CHUNK):
    """Largest divisor of e_pad that is <= max_chunk and a multiple of 128
    (bounds the one-hot temporary to tile_n x 512)."""
    for c in (512, 384, 256, 128):
        if c <= max_chunk and e_pad % c == 0:
            return c
    return 128  # e_pad is always a multiple of 128


def _pad_rows(x, n_pad):
    n = x.shape[0]
    if n_pad == n:
        return x
    return jnp.pad(x, ((0, n_pad - n), (0, 0)))


def _node_resident_vmem_bytes(e_pad, tile_n, tile_ec, h):
    """Conservative VMEM estimate for the resident node kernel (assumes double
    buffering on every pipelined operand)."""
    enew = 2 * e_pad * h * 2                       # resident e_new (bf16)
    recv = 2 * 8 * e_pad * 4                       # (1, e_pad) int32, 8-sublane pad
    x_io = 2 * 2 * tile_n * h * 4                  # x in + x_out tiles (f32)
    acc = tile_n * h * 4
    weights = 2 * (5 * h * h * 2 + 8 * h * 4)      # bf16 weight slab + f32 vec slab
    temps = 4 * tile_n * tile_ec * 4 + 8 * tile_n * h * 4
    return enew + recv + x_io + acc + weights + temps


# ----------------------------------------------------------------------------
# shared in-kernel MLP tail (layers 2-4 + ReLU + LayerNorm), slab-indexed
# ----------------------------------------------------------------------------
def _mlp_tail_ln(h1, w_ref, vec_ref, w2_row):
    """build_mlp layers 2..4 (+ReLU) and the trailing LayerNorm.

    h1: f32 pre-activation of layer 1 (bias already added).
    w_ref: packed bf16 weight slab; w2 starts at row `w2_row`.
    vec_ref: packed f32 (8, H) slab [b1, b2, b3, b4, gamma, beta, 0, 0].
    """
    H = h1.shape[1]

    def dot(a, w):
        return jnp.dot(a.astype(MATMUL_DTYPE), w,
                       preferred_element_type=jnp.float32)

    h = jnp.maximum(h1, 0.0)
    h = dot(h, w_ref[w2_row:w2_row + H, :]) + vec_ref[1:2, :]
    h = jnp.maximum(h, 0.0)
    h = dot(h, w_ref[w2_row + H:w2_row + 2 * H, :]) + vec_ref[2:3, :]
    h = jnp.maximum(h, 0.0)
    y = dot(h, w_ref[w2_row + 2 * H:w2_row + 3 * H, :]) + vec_ref[3:4, :]
    mu = jnp.mean(y, axis=-1, keepdims=True)
    var = jnp.mean((y - mu) ** 2, axis=-1, keepdims=True)
    return (y - mu) * lax.rsqrt(var + LN_EPS) * vec_ref[4:5, :] + vec_ref[5:6, :]


# ----------------------------------------------------------------------------
# Kernel 1: EdgeBlock (concat-free bf16 MLP + LayerNorm + edge residual)
# ----------------------------------------------------------------------------
def _edge_kernel(xs_ref, xr_ref, e_ref, w_ref, vec_ref, enew_ref, eres_ref):
    H = e_ref.shape[1]
    e0 = e_ref[...]                                   # f32, exact residual input
    # Fused concat: [x_s, x_r, e] @ W1 == x_s@W1s + x_r@W1r + e@W1e
    h1 = (jnp.dot(xs_ref[...], w_ref[0:H, :],
                  preferred_element_type=jnp.float32)
          + jnp.dot(xr_ref[...], w_ref[H:2 * H, :],
                    preferred_element_type=jnp.float32)
          + jnp.dot(e0.astype(MATMUL_DTYPE), w_ref[2 * H:3 * H, :],
                    preferred_element_type=jnp.float32)
          + vec_ref[0:1, :])
    y = _mlp_tail_ln(h1, w_ref, vec_ref, 3 * H)
    enew_ref[...] = y.astype(enew_ref.dtype)          # bf16, feeds the scatter
    eres_ref[...] = e0 + y                            # f32 GnBlock edge output


def _edge_block_call(xs_p, xr_p, e_p, pedge, tile_e):
    e_pad, H = e_p.shape
    row = pl.BlockSpec((tile_e, H), lambda i: (i, 0))

    def full(shape):
        return pl.BlockSpec(shape, lambda i: (0, 0))

    return pl.pallas_call(
        _edge_kernel,
        out_shape=(jax.ShapeDtypeStruct((e_pad, H), MATMUL_DTYPE),
                   jax.ShapeDtypeStruct((e_pad, H), jnp.float32)),
        grid=(e_pad // tile_e,),
        in_specs=[row, row, row, full(pedge["w"].shape), full(pedge["vec"].shape)],
        out_specs=(row, row),
        compiler_params=pltpu.CompilerParams(
            dimension_semantics=("parallel",),
            vmem_limit_bytes=VMEM_LIMIT),
    )(xs_p, xr_p, e_p, pedge["w"], pedge["vec"])


# ----------------------------------------------------------------------------
# Kernel 2a: NodeBlock, resident e_new + per-tile chunk ranges (main path)
# ----------------------------------------------------------------------------
def _node_resident_kernel(cstart_ref, ccount_ref, recv_ref, enew_ref, x_ref,
                          w_ref, vec_ref, xout_ref, acc_ref, *, tile_ec):
    i = pl.program_id(0)
    tile_n, H = acc_ref.shape
    acc_ref[...] = jnp.zeros_like(acc_ref)

    # node ids owned by this tile, as a (tile_n, 1) column for the broadcast ==
    node_ids = i * tile_n + lax.broadcasted_iota(jnp.int32, (tile_n, 1), 0)

    def body(c, carry):
        off = pl.multiple_of(c * tile_ec, 128)
        r_chunk = recv_ref[:, pl.ds(off, tile_ec)]            # (1, tile_ec) int32
        e_chunk = enew_ref[pl.ds(off, tile_ec), :]            # (tile_ec, H) bf16
        onehot = (node_ids == r_chunk).astype(MATMUL_DTYPE)   # built in bf16
        acc_ref[...] += jnp.dot(onehot, e_chunk,
                                preferred_element_type=jnp.float32)
        return carry

    # only the chunks whose (sorted) receivers fall in this node tile
    c0 = cstart_ref[i]
    lax.fori_loop(c0, c0 + ccount_ref[i], body, 0)

    x0 = x_ref[...]                                           # f32
    # Fused concat: [x, agg] @ W1 == x@W1x + agg@W1a
    h1 = (jnp.dot(x0.astype(MATMUL_DTYPE), w_ref[0:H, :],
                  preferred_element_type=jnp.float32)
          + jnp.dot(acc_ref[...].astype(MATMUL_DTYPE), w_ref[H:2 * H, :],
                    preferred_element_type=jnp.float32)
          + vec_ref[0:1, :])
    y = _mlp_tail_ln(h1, w_ref, vec_ref, 2 * H)
    xout_ref[...] = x0 + y                                    # fused node residual


def _node_resident_call(cstart, ccount, recv_row, enew, x_p, pnode,
                        tile_n, tile_ec):
    n_pad, H = x_p.shape
    e_pad = enew.shape[0]
    n_tiles = n_pad // tile_n

    node_spec = pl.BlockSpec((tile_n, H), lambda i, cs, cc: (i, 0))

    def full(shape):
        return pl.BlockSpec(shape, lambda i, cs, cc: (0, 0))

    kernel = functools.partial(_node_resident_kernel, tile_ec=tile_ec)
    grid_spec = pltpu.PrefetchScalarGridSpec(
        num_scalar_prefetch=2,
        grid=(n_tiles,),
        in_specs=[
            full((1, e_pad)),          # sorted receivers, VMEM-resident
            full((e_pad, H)),          # sorted e_new (bf16), VMEM-resident
            node_spec,                 # old x (f32)
            full(pnode["w"].shape),    # packed bf16 weight slab (5H, H)
            full(pnode["vec"].shape),  # packed f32 bias/gamma/beta slab (8, H)
        ],
        out_specs=node_spec,
        scratch_shapes=[pltpu.VMEM((tile_n, H), jnp.float32)],
    )
    return pl.pallas_call(
        kernel,
        out_shape=jax.ShapeDtypeStruct((n_pad, H), jnp.float32),
        grid_spec=grid_spec,
        compiler_params=pltpu.CompilerParams(
            dimension_semantics=("parallel",),
            vmem_limit_bytes=VMEM_LIMIT),
    )(cstart, ccount, recv_row, enew, x_p, pnode["w"], pnode["vec"])


# ----------------------------------------------------------------------------
# Kernel 2b: NodeBlock, chunked-streaming fallback (e_new too big for VMEM)
# ----------------------------------------------------------------------------
def _node_stream_kernel(recv_ref, enew_ref, x_ref, w_ref, vec_ref,
                        xout_ref, acc_ref):
    k = pl.program_id(1)
    tile_n, H = acc_ref.shape
    tile_ec = recv_ref.shape[1]

    @pl.when(k == 0)
    def _():
        acc_ref[...] = jnp.zeros_like(acc_ref)

    node_ids = pl.program_id(0) * tile_n + lax.broadcasted_iota(
        jnp.int32, (tile_n, 1), 0)
    onehot = (node_ids == recv_ref[...]).astype(MATMUL_DTYPE)
    acc_ref[...] += jnp.dot(onehot, enew_ref[...],
                            preferred_element_type=jnp.float32)

    @pl.when(k == pl.num_programs(1) - 1)
    def _():
        x0 = x_ref[...]
        h1 = (jnp.dot(x0.astype(MATMUL_DTYPE), w_ref[0:H, :],
                      preferred_element_type=jnp.float32)
              + jnp.dot(acc_ref[...].astype(MATMUL_DTYPE), w_ref[H:2 * H, :],
                        preferred_element_type=jnp.float32)
              + vec_ref[0:1, :])
        y = _mlp_tail_ln(h1, w_ref, vec_ref, 2 * H)
        xout_ref[...] = x0 + y


def _node_stream_call(recv_row, enew, x_p, pnode, tile_n, tile_ec):
    n_pad, H = x_p.shape
    e_pad = enew.shape[0]
    node_spec = pl.BlockSpec((tile_n, H), lambda i, k: (i, 0))

    def full(shape):
        return pl.BlockSpec(shape, lambda i, k: (0, 0))

    return pl.pallas_call(
        _node_stream_kernel,
        out_shape=jax.ShapeDtypeStruct((n_pad, H), jnp.float32),
        grid=(n_pad // tile_n, e_pad // tile_ec),
        in_specs=[
            pl.BlockSpec((1, tile_ec), lambda i, k: (0, k)),   # receivers chunk
            pl.BlockSpec((tile_ec, H), lambda i, k: (k, 0)),   # e_new chunk
            node_spec,
            full(pnode["w"].shape),
            full(pnode["vec"].shape),
        ],
        out_specs=node_spec,
        scratch_shapes=[pltpu.VMEM((tile_n, H), jnp.float32)],
        compiler_params=pltpu.CompilerParams(
            dimension_semantics=("parallel", "arbitrary"),
            vmem_limit_bytes=VMEM_LIMIT),
    )(recv_row, enew, x_p, pnode["w"], pnode["vec"])


# ----------------------------------------------------------------------------
# GnBlock forward (Pallas-backed)
# ----------------------------------------------------------------------------
def gn_block_forward(params, x, edge_attr, edge_index, force_streaming=False):
    """GnBlock.forward: EdgeBlock -> NodeBlock -> residuals.

    Returns (x_out, edge_attr_out); edge_index passes through unchanged.
    """
    senders = edge_index[0].astype(jnp.int32)
    receivers = edge_index[1].astype(jnp.int32)
    num_nodes, hdim = x.shape
    num_edges = edge_attr.shape[0]

    x = x.astype(jnp.float32)
    edge_attr = edge_attr.astype(jnp.float32)

    tile_e, e_pad = _edge_tiles(num_edges)
    tile_n, n_pad = _node_tiles(num_nodes)
    tile_ec = _scatter_chunk(e_pad)
    n_tiles = n_pad // tile_n

    # --- EdgeBlock ------------------------------------------------------
    # XLA-side row gathers, cast to bf16 so the gather writes half the bytes;
    # edge_attr stays f32 because it feeds the exact residual in the kernel.
    # TODO(synk): an in-kernel gather would need per-edge Element BlockSpecs.
    xs_p = _pad_rows(x[senders].astype(MATMUL_DTYPE), e_pad)
    xr_p = _pad_rows(x[receivers].astype(MATMUL_DTYPE), e_pad)
    e_p = _pad_rows(edge_attr, e_pad)
    e_new_p, e_out_p = _edge_block_call(xs_p, xr_p, e_p, params["edge"], tile_e)

    # --- NodeBlock --------------------------------------------------------
    # Sort edges by receiver (XLA argsort + a bf16 permutation of e_new) so
    # each node tile only touches its own scatter chunks; padded edges get a
    # huge sentinel receiver -> sorted last and never matched by the one-hot.
    sentinel = jnp.int32(2 ** 30)
    recv_full = jnp.concatenate(
        [receivers, jnp.full((e_pad - num_edges,), sentinel, jnp.int32)])
    perm = jnp.argsort(recv_full)
    recv_sorted = recv_full[perm]
    e_new_sorted = e_new_p[perm]
    recv_row = recv_sorted[None, :]                    # (1, e_pad) int32
    x_p = _pad_rows(x, n_pad)

    resident_ok = (_node_resident_vmem_bytes(e_pad, tile_n, tile_ec, hdim)
                   <= int(0.8 * VMEM_LIMIT))
    if force_streaming or not resident_ok:
        # huge-E fallback: stream e_new chunks over an "arbitrary" grid axis
        x_out_p = _node_stream_call(recv_row, e_new_sorted, x_p,
                                    params["node"], tile_n, tile_ec)
    else:
        # per-node-tile chunk ranges on the receiver-sorted edge order
        boundaries = jnp.arange(n_tiles + 1, dtype=jnp.int32) * tile_n
        pos = jnp.searchsorted(recv_sorted, boundaries, side="left")
        lo, hi = pos[:-1], pos[1:]
        cstart = (lo // tile_ec).astype(jnp.int32)
        ccount = jnp.maximum(-(-hi // tile_ec) - lo // tile_ec,
                             0).astype(jnp.int32)
        x_out_p = _node_resident_call(cstart, ccount, recv_row, e_new_sorted,
                                      x_p, params["node"], tile_n, tile_ec)

    return x_out_p[:num_nodes], e_out_p[:num_edges]


# ----------------------------------------------------------------------------
# Parameter construction (build_mlp shapes; packed into per-MLP slabs)
# ----------------------------------------------------------------------------
def _init_mlp_params(key, in_size, hidden, out_size):
    ks = jax.random.split(key, 10)

    def lin_w(k, a, b):
        return jax.random.normal(k, (a, b), jnp.float32) / jnp.sqrt(a)

    def lin_b(k, b):
        return 0.01 * jax.random.normal(k, (1, b), jnp.float32)

    return dict(
        w1=lin_w(ks[0], in_size, hidden), b1=lin_b(ks[1], hidden),
        w2=lin_w(ks[2], hidden, hidden), b2=lin_b(ks[3], hidden),
        w3=lin_w(ks[4], hidden, hidden), b3=lin_b(ks[5], hidden),
        w4=lin_w(ks[6], hidden, out_size), b4=lin_b(ks[7], out_size),
        gamma=1.0 + 0.05 * jax.random.normal(ks[8], (1, out_size), jnp.float32),
        beta=0.05 * jax.random.normal(ks[9], (1, out_size), jnp.float32),
    )


def _pack_mlp(p):
    """One bf16 weight slab [W1; W2; W3; W4] + one f32 (8, H) vector slab
    [b1, b2, b3, b4, gamma, beta, 0, 0] per MLP (fewer, larger DMA streams)."""
    hidden = p["w2"].shape[0]
    w = jnp.concatenate([p["w1"], p["w2"], p["w3"], p["w4"]],
                        axis=0).astype(jnp.bfloat16)
    vec = jnp.concatenate([p["b1"], p["b2"], p["b3"], p["b4"],
                           p["gamma"], p["beta"],
                           jnp.zeros((2, hidden), jnp.float32)], axis=0)
    return dict(w=w, vec=vec, raw=p)


def init_gn_block_params(key, hidden_size=128):
    k_e, k_n = jax.random.split(key)
    edge = _init_mlp_params(k_e, 3 * hidden_size, hidden_size, hidden_size)
    node = _init_mlp_params(k_n, 2 * hidden_size, hidden_size, hidden_size)
    return dict(edge=_pack_mlp(edge), node=_pack_mlp(node))


# ----------------------------------------------------------------------------
# Pure-JAX reference with the same numerics (bf16 MXU operands, f32 accum/LN)
# ----------------------------------------------------------------------------
def _gn_block_ref(params, x, edge_attr, edge_index):
    bf = jnp.bfloat16

    def dot(a, w):
        return jnp.dot(a.astype(bf), w.astype(bf),
                       preferred_element_type=jnp.float32)

    def mlp_ln(xin, p):
        h = jnp.maximum(dot(xin, p["w1"]) + p["b1"], 0.0)
        h = jnp.maximum(dot(h, p["w2"]) + p["b2"], 0.0)
        h = jnp.maximum(dot(h, p["w3"]) + p["b3"], 0.0)
        y = dot(h, p["w4"]) + p["b4"]
        mu = jnp.mean(y, axis=-1, keepdims=True)
        var = jnp.mean((y - mu) ** 2, axis=-1, keepdims=True)
        return (y - mu) * lax.rsqrt(var + LN_EPS) * p["gamma"] + p["beta"]

    senders, receivers = edge_index[0], edge_index[1]
    collected = jnp.concatenate([x[senders], x[receivers], edge_attr], axis=1)
    e_new = mlp_ln(collected, params["edge"]["raw"])
    agg = jax.ops.segment_sum(e_new.astype(bf).astype(jnp.float32), receivers,
                              num_segments=x.shape[0])
    x_new = mlp_ln(jnp.concatenate([x, agg], axis=1), params["node"]["raw"])
    return x + x_new, edge_attr + e_new


# ----------------------------------------------------------------------------
if __name__ == "__main__":
    key = jax.random.PRNGKey(0)
    k_param, k_node, k_edge, k_s, k_r = jax.random.split(key, 5)

    hidden_size = 128          # GnBlock default
    num_nodes = 50
    num_edges = 120

    params = init_gn_block_params(k_param, hidden_size)
    x = jax.random.normal(k_node, (num_nodes, hidden_size), jnp.float32)
    edge_attr = jax.random.normal(k_edge, (num_edges, hidden_size), jnp.float32)
    edge_index = jnp.stack([
        jax.random.randint(k_s, (num_edges,), 0, num_nodes, dtype=jnp.int32),
        jax.random.randint(k_r, (num_edges,), 0, num_nodes, dtype=jnp.int32),
    ], axis=0)

    x_ref, e_ref = _gn_block_ref(params, x, edge_attr, edge_index)

    # exercise both node-block paths (resident main path + streaming fallback)
    for force_streaming in (False, True):
        x_out, e_out = gn_block_forward(params, x, edge_attr, edge_index,
                                        force_streaming=force_streaming)
        x_out = jax.block_until_ready(x_out)
        e_out = jax.block_until_ready(e_out)
        assert x_out.shape == (num_nodes, hidden_size), x_out.shape
        assert e_out.shape == (num_edges, hidden_size), e_out.shape
        assert jnp.allclose(x_out, x_ref, atol=2e-2, rtol=2e-2), (
            force_streaming, float(jnp.max(jnp.abs(x_out - x_ref))))
        assert jnp.allclose(e_out, e_ref, atol=2e-2, rtol=2e-2), (
            force_streaming, float(jnp.max(jnp.abs(e_out - e_ref))))

    print("KERNEL_OK")
</pallas_src>

<mosaic_0001>
module attributes {stable_mosaic.version = 11 : i64} {
  func.func @_edge_kernel(%arg0: i32, %arg1: memref<128x128xbf16, #tpu.memory_space<vmem>>, %arg2: memref<128x128xbf16, #tpu.memory_space<vmem>>, %arg3: memref<128x128xf32, #tpu.memory_space<vmem>>, %arg4: memref<768x128xbf16, #tpu.memory_space<vmem>>, %arg5: memref<8x128xf32, #tpu.memory_space<vmem>>, %arg6: memref<128x128xbf16, #tpu.memory_space<vmem>>, %arg7: memref<128x128xf32, #tpu.memory_space<vmem>>) attributes {dimension_semantics = [#tpu.dimension_semantics<parallel>], iteration_bounds = array<i64: 1>, scalar_prefetch = 0 : i64, scratch_operands = 0 : i64, tpu.core_type = #tpu.core_type<tc>, window_params = [{transform_indices = @transform_0, window_bounds = array<i64: 128, 128>}, {transform_indices = @transform_1, window_bounds = array<i64: 128, 128>}, {transform_indices = @transform_2, window_bounds = array<i64: 128, 128>}, {pipeline_mode = #tpu.pipeline_mode<synchronous>, transform_indices = @transform_3, window_bounds = array<i64: 768, 128>}, {pipeline_mode = #tpu.pipeline_mode<synchronous>, transform_indices = @transform_4, window_bounds = array<i64: 8, 128>}, {transform_indices = @transform_5, window_bounds = array<i64: 128, 128>}, {transform_indices = @transform_6, window_bounds = array<i64: 128, 128>}]} {
    %c0 = arith.constant 0 : index
    %c0_0 = arith.constant 0 : index
    %0 = vector.load %arg3[%c0, %c0_0] : memref<128x128xf32, #tpu.memory_space<vmem>>, vector<128x128xf32>
    %c0_1 = arith.constant 0 : index
    %c0_2 = arith.constant 0 : index
    %1 = vector.load %arg1[%c0_1, %c0_2] : memref<128x128xbf16, #tpu.memory_space<vmem>>, vector<128x128xbf16>
    %c0_3 = arith.constant 0 : index
    %c0_4 = arith.constant 0 : index
    %2 = vector.load %arg4[%c0_3, %c0_4] : memref<768x128xbf16, #tpu.memory_space<vmem>>, vector<128x128xbf16>
    %cst = arith.constant dense<0.000000e+00> : vector<128x128xf32>
    %3 = tpu.matmul %1, %2, %cst {dimension_numbers = #tpu.dot_dimension_numbers<[1], [0], [0], [1], [0, 0, 1, 1], [], []>} : vector<128x128xbf16>, vector<128x128xbf16>, vector<128x128xf32> -> vector<128x128xf32>
    %c0_5 = arith.constant 0 : index
    %c0_6 = arith.constant 0 : index
    %4 = vector.load %arg2[%c0_5, %c0_6] : memref<128x128xbf16, #tpu.memory_space<vmem>>, vector<128x128xbf16>
    %c128 = arith.constant 128 : index
    %c0_7 = arith.constant 0 : index
    %5 = vector.load %arg4[%c128, %c0_7] : memref<768x128xbf16, #tpu.memory_space<vmem>>, vector<128x128xbf16>
    %cst_8 = arith.constant dense<0.000000e+00> : vector<128x128xf32>
    %6 = tpu.matmul %4, %5, %cst_8 {dimension_numbers = #tpu.dot_dimension_numbers<[1], [0], [0], [1], [0, 0, 1, 1], [], []>} : vector<128x128xbf16>, vector<128x128xbf16>, vector<128x128xf32> -> vector<128x128xf32>
    %7 = arith.addf %3, %6 : vector<128x128xf32>
    %8 = arith.truncf %0 : vector<128x128xf32> to vector<128x128xbf16>
    %c256 = arith.constant 256 : index
    %c0_9 = arith.constant 0 : index
    %9 = vector.load %arg4[%c256, %c0_9] : memref<768x128xbf16, #tpu.memory_space<vmem>>, vector<128x128xbf16>
    %cst_10 = arith.constant dense<0.000000e+00> : vector<128x128xf32>
    %10 = tpu.matmul %8, %9, %cst_10 {dimension_numbers = #tpu.dot_dimension_numbers<[1], [0], [0], [1], [0, 0, 1, 1], [], []>} : vector<128x128xbf16>, vector<128x128xbf16>, vector<128x128xf32> -> vector<128x128xf32>
    %11 = arith.addf %7, %10 : vector<128x128xf32>
    %c0_11 = arith.constant 0 : index
    %c0_12 = arith.constant 0 : index
    %12 = vector.load %arg5[%c0_11, %c0_12] : memref<8x128xf32, #tpu.memory_space<vmem>>, vector<1x128xf32>
    %13 = vector.broadcast %12 : vector<1x128xf32> to vector<128x128xf32>
    %14 = arith.addf %11, %13 : vector<128x128xf32>
    %cst_13 = arith.constant 0.000000e+00 : f32
    %15 = vector.broadcast %cst_13 : f32 to vector<128x128xf32>
    %16 = arith.maximumf %14, %15 : vector<128x128xf32>
    %c384 = arith.constant 384 : index
    %c0_14 = arith.constant 0 : index
    %17 = vector.load %arg4[%c384, %c0_14] : memref<768x128xbf16, #tpu.memory_space<vmem>>, vector<128x128xbf16>
    %18 = arith.truncf %16 : vector<128x128xf32> to vector<128x128xbf16>
    %cst_15 = arith.constant dense<0.000000e+00> : vector<128x128xf32>
    %19 = tpu.matmul %18, %17, %cst_15 {dimension_numbers = #tpu.dot_dimension_numbers<[1], [0], [0], [1], [0, 0, 1, 1], [], []>} : vector<128x128xbf16>, vector<128x128xbf16>, vector<128x128xf32> -> vector<128x128xf32>
    %c1 = arith.constant 1 : index
    %c0_16 = arith.constant 0 : index
    %20 = vector.load %arg5[%c1, %c0_16] : memref<8x128xf32, #tpu.memory_space<vmem>>, vector<1x128xf32>
    %21 = vector.broadcast %20 : vector<1x128xf32> to vector<128x128xf32>
    %22 = arith.addf %19, %21 : vector<128x128xf32>
    %cst_17 = arith.constant 0.000000e+00 : f32
    %23 = vector.broadcast %cst_17 : f32 to vector<128x128xf32>
    %24 = arith.maximumf %22, %23 : vector<128x128xf32>
    %c512 = arith.constant 512 : index
    %c0_18 = arith.constant 0 : index
    %25 = vector.load %arg4[%c512, %c0_18] : memref<768x128xbf16, #tpu.memory_space<vmem>>, vector<128x128xbf16>
    %26 = arith.truncf %24 : vector<128x128xf32> to vector<128x128xbf16>
    %cst_19 = arith.constant dense<0.000000e+00> : vector<128x128xf32>
    %27 = tpu.matmul %26, %25, %cst_19 {dimension_numbers = #tpu.dot_dimension_numbers<[1], [0], [0], [1], [0, 0, 1, 1], [], []>} : vector<128x128xbf16>, vector<128x128xbf16>, vector<128x128xf32> -> vector<128x128xf32>
    %c2 = arith.constant 2 : index
    %c0_20 = arith.constant 0 : index
    %28 = vector.load %arg5[%c2, %c0_20] : memref<8x128xf32, #tpu.memory_space<vmem>>, vector<1x128xf32>
    %29 = vector.broadcast %28 : vector<1x128xf32> to vector<128x128xf32>
    %30 = arith.addf %27, %29 : vector<128x128xf32>
    %cst_21 = arith.constant 0.000000e+00 : f32
    %31 = vector.broadcast %cst_21 : f32 to vector<128x128xf32>
    %32 = arith.maximumf %30, %31 : vector<128x128xf32>
    %c640 = arith.constant 640 : index
    %c0_22 = arith.constant 0 : index
    %33 = vector.load %arg4[%c640, %c0_22] : memref<768x128xbf16, #tpu.memory_space<vmem>>, vector<128x128xbf16>
    %34 = arith.truncf %32 : vector<128x128xf32> to vector<128x128xbf16>
    %cst_23 = arith.constant dense<0.000000e+00> : vector<128x128xf32>
    %35 = tpu.matmul %34, %33, %cst_23 {dimension_numbers = #tpu.dot_dimension_numbers<[1], [0], [0], [1], [0, 0, 1, 1], [], []>} : vector<128x128xbf16>, vector<128x128xbf16>, vector<128x128xf32> -> vector<128x128xf32>
    %c3 = arith.constant 3 : index
    %c0_24 = arith.constant 0 : index
    %36 = vector.load %arg5[%c3, %c0_24] : memref<8x128xf32, #tpu.memory_space<vmem>>, vector<1x128xf32>
    %37 = vector.broadcast %36 : vector<1x128xf32> to vector<128x128xf32>
    %38 = arith.addf %35, %37 : vector<128x128xf32>
    %cst_25 = arith.constant dense<0.000000e+00> : vector<128xf32>
    %39 = vector.multi_reduction <add>, %38, %cst_25 [1] : vector<128x128xf32> to vector<128xf32>
    %40 = vector.shape_cast %39 : vector<128xf32> to vector<128x1xf32>
    %cst_26 = arith.constant 1.280000e+02 : f32
    %41 = vector.broadcast %cst_26 : f32 to vector<128x1xf32>
    %42 = arith.divf %40, %41 : vector<128x1xf32>
    %43 = vector.broadcast %42 : vector<128x1xf32> to vector<128x128xf32>
    %44 = arith.subf %38, %43 : vector<128x128xf32>
    %45 = arith.mulf %44, %44 : vector<128x128xf32>
    %cst_27 = arith.constant dense<0.000000e+00> : vector<128xf32>
    %46 = vector.multi_reduction <add>, %45, %cst_27 [1] : vector<128x128xf32> to vector<128xf32>
    %47 = vector.shape_cast %46 : vector<128xf32> to vector<128x1xf32>
    %cst_28 = arith.constant 1.280000e+02 : f32
    %48 = vector.broadcast %cst_28 : f32 to vector<128x1xf32>
    %49 = arith.divf %47, %48 : vector<128x1xf32>
    %50 = vector.broadcast %42 : vector<128x1xf32> to vector<128x128xf32>
    %51 = arith.subf %38, %50 : vector<128x128xf32>
    %cst_29 = arith.constant 9.99999974E-6 : f32
    %52 = vector.broadcast %cst_29 : f32 to vector<128x1xf32>
    %53 = arith.addf %49, %52 : vector<128x1xf32>
    %54 = math.rsqrt %53 : vector<128x1xf32>
    %55 = vector.broadcast %54 : vector<128x1xf32> to vector<128x128xf32>
    %56 = arith.mulf %51, %55 : vector<128x128xf32>
    %c4 = arith.constant 4 : index
    %c0_30 = arith.constant 0 : index
    %57 = vector.load %arg5[%c4, %c0_30] : memref<8x128xf32, #tpu.memory_space<vmem>>, vector<1x128xf32>
    %58 = vector.broadcast %57 : vector<1x128xf32> to vector<128x128xf32>
    %59 = arith.mulf %56, %58 : vector<128x128xf32>
    %c5 = arith.constant 5 : index
    %c0_31 = arith.constant 0 : index
    %60 = vector.load %arg5[%c5, %c0_31] : memref<8x128xf32, #tpu.memory_space<vmem>>, vector<1x128xf32>
    %61 = vector.broadcast %60 : vector<1x128xf32> to vector<128x128xf32>
    %62 = arith.addf %59, %61 : vector<128x128xf32>
    %63 = arith.truncf %62 : vector<128x128xf32> to vector<128x128xbf16>
    %c0_32 = arith.constant 0 : index
    %c0_33 = arith.constant 0 : index
    %64 = vector.load %arg6[%c0_32, %c0_33] : memref<128x128xbf16, #tpu.memory_space<vmem>>, vector<128x128xbf16>
    tpu.vector_store %arg6[%c0_32, %c0_33], %63 {strides = array<i32>} : memref<128x128xbf16, #tpu.memory_space<vmem>>, vector<128x128xbf16>,
    %65 = arith.addf %0, %62 : vector<128x128xf32>
    %c0_34 = arith.constant 0 : index
    %c0_35 = arith.constant 0 : index
    %66 = vector.load %arg7[%c0_34, %c0_35] : memref<128x128xf32, #tpu.memory_space<vmem>>, vector<128x128xf32>
    tpu.vector_store %arg7[%c0_34, %c0_35], %65 {strides = array<i32>} : memref<128x128xf32, #tpu.memory_space<vmem>>, vector<128x128xf32>,
    return
  }
  func.func @transform_0(%arg0: i32) -> (i32, i32) {
    %c0_i32 = arith.constant 0 : i32
    %c0_i32_0 = arith.constant 0 : i32
    return %arg0, %c0_i32 : i32, i32
  }
  func.func @transform_1(%arg0: i32) -> (i32, i32) {
    %c0_i32 = arith.constant 0 : i32
    %c0_i32_0 = arith.constant 0 : i32
    return %arg0, %c0_i32 : i32, i32
  }
  func.func @transform_2(%arg0: i32) -> (i32, i32) {
    %c0_i32 = arith.constant 0 : i32
    %c0_i32_0 = arith.constant 0 : i32
    return %arg0, %c0_i32 : i32, i32
  }
  func.func @transform_3(%arg0: i32) -> (i32, i32) {
    %c0_i32 = arith.constant 0 : i32
    %c0_i32_0 = arith.constant 0 : i32
    %c0_i32_1 = arith.constant 0 : i32
    return %c0_i32, %c0_i32_0 : i32, i32
  }
  func.func @transform_4(%arg0: i32) -> (i32, i32) {
    %c0_i32 = arith.constant 0 : i32
    %c0_i32_0 = arith.constant 0 : i32
    %c0_i32_1 = arith.constant 0 : i32
    return %c0_i32, %c0_i32_0 : i32, i32
  }
  func.func @transform_5(%arg0: i32) -> (i32, i32) {
    %c0_i32 = arith.constant 0 : i32
    %c0_i32_0 = arith.constant 0 : i32
    return %arg0, %c0_i32 : i32, i32
  }
  func.func @transform_6(%arg0: i32) -> (i32, i32) {
    %c0_i32 = arith.constant 0 : i32
    %c0_i32_0 = arith.constant 0 : i32
    return %arg0, %c0_i32 : i32, i32
  }
}

</mosaic_0001>

<bundles_post_ra>
// kernel: tpu_custom_call.1
= control target key start
LH: loop header
LB: loop body
LE: loop exit
PB: predicated region body
PF: predicated region fallthrough
CT: control target
= control target key end

     0   :  { %12 = vsyncpa [#allocation3], 0  ;;  %s2485_s0 = inlined_call_operand.hbm [shape: bf16[128,128], index: 0, kind: input, shape index: {}]   ;;  %s2486_s1 = inlined_call_operand.hbm [shape: bf16[128,128], index: 1, kind: input, shape index: {}]   ;;  %s2487_s2 = inlined_call_operand.hbm [shape: f32[128,128], index: 2, kind: input, shape index: {}]   ;;  %s2488_s3 = inlined_call_operand.hbm [shape: bf16[768,128], index: 3, kind: input, shape index: {}]   ;;  %s2489_s4 = inlined_call_operand.hbm [shape: f32[8,128], index: 4, kind: input, shape index: {}]   ;;  %s2490_s5 = inlined_call_operand.hbm [shape: bf16[128,128], index: 5, kind: output, shape index: {0}]   ;;  %s2491_s6 = inlined_call_operand.hbm [shape: f32[128,128], index: 6, kind: output, shape index: {1}]  }
   0x1   :  { %13 = vsyncpa [#allocation6], 0 }
   0x2   :  { %14 = vsyncpa [#allocation9], 0 }
   0x3   :  { %15 = vsyncpa [#allocation4], 0 }
   0x4   :  { %16 = vsyncpa [#allocation13], 0  ;;  %s34_s23 = sshll.u32 %s2486_s1, 4  ;;  %s2137_s24 = smov [#allocation5]   ;;  %s35_s23 = int_to_ptr.hbm [resolvable:$true] %s34_s23 }
   0x5   :  { %s36_s25 = sshll.u32 %s2137_s24, 4  ;;  %s60_s28 = sshll.u32 %s2488_s3, 4  ;;  %s37_s25 = int_to_ptr.vmem [resolvable:$true] %s36_s25  ;;  %s61_s28 = int_to_ptr.hbm [resolvable:$true] %s60_s28 }
   0x6   :  { %s2138_s29 = smov 64   ;;  %s2139_s30 = smov 4  }
   0x7   :  { %42 = dma.hbm_to_vmem [thread:$0]  %s35_s23, 1024, %s37_s25, [#allocation6], %s2138_s29, %s2138_s29, %s2139_s30  }
   0x8   :  { %s2140_s7 = smov [#allocation8]   ;;  %s21_s1 = sshll.u32 %s2485_s0, 4  ;;  %s22_s1 = int_to_ptr.hbm [resolvable:$true] %s21_s1 }
   0x9   :  { %s62_s8 = sshll.u32 %s2140_s7, 4  ;;  %s47_s12 = sshll.u32 %s2487_s2, 4  ;;  %s63_s8 = int_to_ptr.vmem [resolvable:$true] %s62_s8  ;;  %s48_s12 = int_to_ptr.hbm [resolvable:$true] %s47_s12 }
   0xa   :  { %68 = dma.hbm_to_vmem [thread:$0]  %s61_s28, 6144, %s63_s8, [#allocation9], %s2138_s29, %s2138_s29, %s2139_s30  }
   0xb   :  { %s2141_s13 = smov [#allocation2]   ;;  %s2142_s15 = smov [#allocation7]  }
   0xc   :  { %s23_s14 = sshll.u32 %s2141_s13, 4  ;;  %s49_s0 = sshll.u32 %s2142_s15, 4  ;;  %s24_s14 = int_to_ptr.vmem [resolvable:$true] %s23_s14  ;;  %s50_s0 = int_to_ptr.vmem [resolvable:$true] %s49_s0 }
   0xd   :  { %29 = dma.hbm_to_vmem [thread:$0]  %s22_s1, 1024, %s24_s14, [#allocation3], %s2138_s29, %s2138_s29, %s2139_s30  }
   0xe   :  { %s2143_s16 = smov 128   ;;  %s2144_s17 = smov 8  }
   0xf   :  { %55 = dma.hbm_to_vmem [thread:$0]  %s48_s12, 2048, %s50_s0, [#allocation6], %s2143_s16, %s2143_s16, %s2144_s17  }
  0x10   :  { %s74_s2 = sshll.u32 %s2489_s4, 4  ;;  %s2145_s20 = smov [#allocation10]   ;;  %s75_s2 = int_to_ptr.hbm [resolvable:$true] %s74_s2 }
  0x11   :  { %s76_s21 = sshll.u32 %s2145_s20, 4  ;;  %s77_s21 = int_to_ptr.vmem [resolvable:$true] %s76_s21 }
  0x12   :  { %79 = dma.hbm_to_vmem [thread:$0]  %s75_s2, 128, %s77_s21, [#allocation9]  }
  0x13   :  { %2127 = dma.done.wait [#allocation3], 1024  }
  0x14   :  { %2128 = vsyncadd [#allocation3], 4294966272 }
  0x15   :  { %2129 = dma.done.wait [#allocation6], 3072  }
  0x16   :  { %2130 = vsyncadd [#allocation6], 4294964224 }
  0x17   :  { %2131 = dma.done.wait [#allocation9], 6272  }
  0x18   :  { %2132 = vsyncadd [#allocation9], 4294961024  ;;  %v1795_v0 = vld [vmem:[#allocation8 + $0x78] sm:$0xff]  ;;  %v1794_v2 = vld [vmem:[#allocation8 + $0x70] sm:$0xff]  ;;  %s2147_s4 = smov [#allocation11]   ;;  %s1475_s25 = sshll.u32 %s2490_s5, 4  ;;  %s1476_s25 = int_to_ptr.hbm [resolvable:$true] %s1475_s25 }
  0x19   :  { %v1779_v1 = vld [vmem:[#allocation8 + $0x38] sm:$0xff]  ;;  %1875 = vmatpush.bf16.msra.mxu2 %v1795_v0  ;;  %v1778_v3 = vld [vmem:[#allocation8 + $0x30] sm:$0xff]  ;;  %276 = vmatpush.bf16.msra.mxu0 %v1795_v0  ;;  %v1793_v4 = vld [vmem:[#allocation8 + $0x68] sm:$0xff]  ;;  %s1473_s22 = sshll.u32 %s2147_s4, 4  ;;  %s2148_s26 = smov [#allocation12]   ;;  %s1474_s22 = int_to_ptr.vmem [resolvable:$true] %s1473_s22 }
  0x1a   :  { %1883 = vmatpush.bf16.msra.mxu3 %v1779_v1  ;;  %421 = vmatpush.bf16.msra.mxu1 %v1779_v1  ;;  %v1777_v5 = vld [vmem:[#allocation8 + $0x28] sm:$0xff]  ;;  %v1792_v6 = vld [vmem:[#allocation8 + $0x60] sm:$0xff]  ;;  %v1791_v8 = vld [vmem:[#allocation8 + $0x58] sm:$0xff]  ;;  %s1486_s27 = sshll.u32 %s2148_s26, 4  ;;  %s1488_s8 = sshll.u32 %s2491_s6, 4  ;;  %s1487_s27 = int_to_ptr.vmem [resolvable:$true] %s1486_s27  ;;  %s1489_s8 = int_to_ptr.hbm [resolvable:$true] %s1488_s8 }
  0x1b   :  { %v1776_v7 = vld [vmem:[#allocation8 + $0x20] sm:$0xff]  ;;  %v1775_v9 = vld [vmem:[#allocation8 + $0x18] sm:$0xff]  ;;  %v1790_v10 = vld [vmem:[#allocation8 + $0x50] sm:$0xff] }
  0x1c   :  { %v1774_v11 = vld [vmem:[#allocation8 + $0x10] sm:$0xff]  ;;  %v1789_v12 = vld [vmem:[#allocation8 + $0x48] sm:$0xff]  ;;  %v1788_v14 = vld [vmem:[#allocation8 + $0x40] sm:$0xff] }
  0x1d   :  { %1876 = vmatpush.bf16.msra.mxu2 %v1794_v2  ;;  %277 = vmatpush.bf16.msra.mxu0 %v1794_v2  ;;  %v1773_v13 = vld [vmem:[#allocation8 + $0x8] sm:$0xff]  ;;  %v1772_v15 = vld [vmem:[#allocation8] sm:$0xff]  ;;  %v1803_v16 = vld [vmem:[#allocation8 + $0xb8] sm:$0xff] }
  0x1e   :  { %1884 = vmatpush.bf16.msra.mxu3 %v1778_v3  ;;  %422 = vmatpush.bf16.msra.mxu1 %v1778_v3  ;;  %v1784_v17 = vld [vmem:[#allocation5 + $0x20] sm:$0xff]  ;;  %v1802_v19 = vld [vmem:[#allocation8 + $0xb0] sm:$0xff]  ;;  %v1801_v20 = vld [vmem:[#allocation8 + $0xa8] sm:$0xff] }
  0x1f   :  { %v1768_v18 = vld [vmem:[#allocation2 + $0x20] sm:$0xff]  ;;  %v1799_v22 = vld [vmem:[#allocation8 + $0x98] sm:$0xff]  ;;  %v1785_v23 = vld [vmem:[#allocation5 + $0x28] sm:$0xff] }
  0x20   :  { %v1800_v21 = vld [vmem:[#allocation8 + $0xa0] sm:$0xff]  ;;  %v1769_v24 = vld [vmem:[#allocation2 + $0x28] sm:$0xff]  ;;  %v1798_v25 = vld [vmem:[#allocation8 + $0x90] sm:$0xff] }
  0x21   :  { %1877 = vmatpush.bf16.msra.mxu2 %v1793_v4  ;;  %278 = vmatpush.bf16.msra.mxu0 %v1793_v4  ;;  %v1780_v26 = vld [vmem:[#allocation5] sm:$0xff]  ;;  %v1797_v28 = vld [vmem:[#allocation8 + $0x88] sm:$0xff]  ;;  %v1786_v30 = vld [vmem:[#allocation5 + $0x30] sm:$0xff] }
  0x22   :  { %1885 = vmatpush.bf16.msra.mxu3 %v1777_v5  ;;  %423 = vmatpush.bf16.msra.mxu1 %v1777_v5  ;;  %v1764_v27 = vld [vmem:[#allocation2] sm:$0xff]  ;;  %v1770_v31 = vld [vmem:[#allocation2 + $0x30] sm:$0xff]  ;;  %v1781_v32 = vld [vmem:[#allocation5 + $0x8] sm:$0xff] }
  0x23   :  { %v1796_v29 = vld [vmem:[#allocation8 + $0x80] sm:$0xff]  ;;  %v1765_v33 = vld [vmem:[#allocation2 + $0x8] sm:$0xff]  ;;  %v1787_v34 = vld [vmem:[#allocation5 + $0x38] sm:$0xff] }
  0x24   :  { %v1771_v35 = vld [vmem:[#allocation2 + $0x38] sm:$0xff]  ;;  %v1782_v36 = vld [vmem:[#allocation5 + $0x10] sm:$0xff]  ;;  %v100_v38 = vld [vmem:[#allocation7] sm:$0xff] }
  0x25   :  { %1878 = vmatpush.bf16.msra.mxu2 %v1792_v6  ;;  %279 = vmatpush.bf16.msra.mxu0 %v1792_v6  ;;  %v1766_v37 = vld [vmem:[#allocation2 + $0x10] sm:$0xff]  ;;  %v101_v39 = vld [vmem:[#allocation7 + $0x8] sm:$0xff]  ;;  %v1783_v41 = vld [vmem:[#allocation5 + $0x18] sm:$0xff] }
  0x26   :  { %1886 = vmatpush.bf16.msra.mxu3 %v1776_v7  ;;  %424 = vmatpush.bf16.msra.mxu1 %v1776_v7  ;;  %v470_v40 = vpack.c.bf16 %v101_v39, %v100_v38  ;;  %v1767_v42 = vld [vmem:[#allocation2 + $0x18] sm:$0xff]  ;;  %v102_v43 = vld [vmem:[#allocation7 + $0x10] sm:$0xff]  ;;  %v104_v46 = vld [vmem:[#allocation7 + $0x20] sm:$0xff] }
  0x27   :  { %v103_v44 = vld [vmem:[#allocation7 + $0x18] sm:$0xff]  ;;  %v105_v47 = vld [vmem:[#allocation7 + $0x28] sm:$0xff]  ;;  %v106_v49 = vld [vmem:[#allocation7 + $0x30] sm:$0xff] }
  0x28   :  { %v471_v45 = vpack.c.bf16 %v103_v44, %v102_v43  ;;  %v472_v48 = vpack.c.bf16 %v105_v47, %v104_v46  ;;  %v107_v50 = vld [vmem:[#allocation7 + $0x38] sm:$0xff]  ;;  %v108_v53 = vld [vmem:[#allocation7 + $0x40] sm:$0xff]  ;;  %v109_v54 = vld [vmem:[#allocation7 + $0x48] sm:$0xff] }
  0x29   :  { %1879 = vmatpush.bf16.msra.mxu2 %v1791_v8  ;;  %280 = vmatpush.bf16.msra.mxu0 %v1791_v8  ;;  %v473_v51 = vpack.c.bf16 %v107_v50, %v106_v49  ;;  %v1811_v52 = vld [vmem:[#allocation8 + $0xf8] sm:$0xff]  ;;  %v474_v55 = vpack.c.bf16 %v109_v54, %v108_v53  ;;  %v1810_v56 = vld [vmem:[#allocation8 + $0xf0] sm:$0xff]  ;;  %v1809_v58 = vld [vmem:[#allocation8 + $0xe8] sm:$0xff] }
  0x2a   :  { %1887 = vmatpush.bf16.msra.mxu3 %v1775_v9  ;;  %425 = vmatpush.bf16.msra.mxu1 %v1775_v9  ;;  %v110_v59 = vld [vmem:[#allocation7 + $0x50] sm:$0xff]  ;;  %v111_v60 = vld [vmem:[#allocation7 + $0x58] sm:$0xff]  ;;  %v1808_v63 = vld [vmem:[#allocation8 + $0xe0] sm:$0xff] }
  0x2b   :  { %v475_v62 = vpack.c.bf16 %v111_v60, %v110_v59  ;;  %v1807_v1 = vld [vmem:[#allocation8 + $0xd8] sm:$0xff]  ;;  %v112_v2 = vld [vmem:[#allocation7 + $0x60] sm:$0xff]  ;;  %v113_v3 = vld [vmem:[#allocation7 + $0x68] sm:$0xff] }
  0x2c   :  { %v476_v5 = vpack.c.bf16 %v113_v3, %v112_v2  ;;  %v1806_v6 = vld [vmem:[#allocation8 + $0xd0] sm:$0xff]  ;;  %v1805_v8 = vld [vmem:[#allocation8 + $0xc8] sm:$0xff] }
  0x2d   :  { %1880 = vmatpush.bf16.msra.mxu2 %v1790_v10  ;;  %281 = vmatpush.bf16.msra.mxu0 %v1790_v10  ;;  %v114_v9 = vld [vmem:[#allocation7 + $0x70] sm:$0xff]  ;;  %v115_v10 = vld [vmem:[#allocation7 + $0x78] sm:$0xff] }
  0x2e   :  { %1888 = vmatpush.bf16.msra.mxu3 %v1774_v11  ;;  %426 = vmatpush.bf16.msra.mxu1 %v1774_v11 }
  0x31   :  { %1881 = vmatpush.bf16.msra.mxu2 %v1789_v12  ;;  %282 = vmatpush.bf16.msra.mxu0 %v1789_v12  ;;  %v477_v12 = vpack.c.bf16 %v115_v10, %v114_v9 }
  0x32   :  { %1889 = vmatpush.bf16.msra.mxu3 %v1773_v13  ;;  %427 = vmatpush.bf16.msra.mxu1 %v1773_v13  ;;  %v1804_v13 = vld [vmem:[#allocation8 + $0xc0] sm:$0xff] }
  0x35   :  { %1882 = vmatpush.bf16.msra.mxu2 %v1788_v14  ;;  %283 = vmatpush.bf16.msra.mxu0 %v1788_v14 }
  0x36   :  { %1890 = vmatpush.bf16.msra.mxu3 %v1772_v15  ;;  %428 = vmatpush.bf16.msra.mxu1 %v1772_v15 }
  0x38   :  { %304 = vmatmul.bf16.vlgmr.msra.gmra.mxu2 %v1784_v17  ;;  %284 = vmatmul.bf16.vlgmr.msra.gmra.mxu0 %v1780_v26 }
  0x39   :  { %542 = vmatpush.bf16.msrb.mxu2 %v1803_v16  ;;  %449 = vmatmul.bf16.vlgmr.msra.gmra.mxu3 %v1768_v18 }
  0x3a   :  { %429 = vmatmul.bf16.vlgmr.msra.gmra.mxu1 %v1764_v27  ;;  %715 = vmatpush.bf16.msrb.mxu3 %v1811_v52 }
  0x3d   :  { %543 = vmatpush.bf16.msrb.mxu2 %v1802_v19 }
  0x3e   :  { %716 = vmatpush.bf16.msrb.mxu3 %v1810_v56 }
  0x41   :  { %544 = vmatpush.bf16.msrb.mxu2 %v1801_v20 }
  0x42   :  { %717 = vmatpush.bf16.msrb.mxu3 %v1809_v58 }
  0x45   :  { %545 = vmatpush.bf16.msrb.mxu2 %v1800_v21 }
  0x46   :  { %718 = vmatpush.bf16.msrb.mxu3 %v1808_v63 }
  0x48   :  { %309 = vmatmul.bf16.gmra.mxu2 %v1785_v23  ;;  %289 = vmatmul.bf16.gmra.mxu0 %v1781_v32 }
  0x49   :  { %546 = vmatpush.bf16.msrb.mxu2 %v1799_v22  ;;  %454 = vmatmul.bf16.gmra.mxu3 %v1769_v24 }
  0x4a   :  { %434 = vmatmul.bf16.gmra.mxu1 %v1765_v33  ;;  %719 = vmatpush.bf16.msrb.mxu3 %v1807_v1 }
  0x4d   :  { %547 = vmatpush.bf16.msrb.mxu2 %v1798_v25  ;;  %v2227_v25 = vld [vmem:[#allocation10] ss:$0 sm:$0xff] }
  0x4e   :  { %720 = vmatpush.bf16.msrb.mxu3 %v1806_v6 }
  0x51   :  { %548 = vmatpush.bf16.msrb.mxu2 %v1797_v28 }
  0x52   :  { %721 = vmatpush.bf16.msrb.mxu3 %v1805_v8 }
  0x55   :  { %549 = vmatpush.bf16.msrb.mxu2 %v1796_v29 }
  0x56   :  { %722 = vmatpush.bf16.msrb.mxu3 %v1804_v13 }
  0x58   :  { %314 = vmatmul.bf16.gmra.mxu2 %v1786_v30  ;;  %294 = vmatmul.bf16.gmra.mxu0 %v1782_v36 }
  0x59   :  { %459 = vmatmul.bf16.gmra.mxu3 %v1770_v31 }
  0x5a   :  { %439 = vmatmul.bf16.gmra.mxu1 %v1766_v37 }
  0x68   :  { %319 = vmatmul.bf16.gmra.mxu2 %v1787_v34  ;;  %299 = vmatmul.bf16.gmra.mxu0 %v1783_v41 }
  0x69   :  { %464 = vmatmul.bf16.gmra.mxu3 %v1771_v35 }
  0x6a   :  { %444 = vmatmul.bf16.gmra.mxu1 %v1767_v42 }
  0x78   :  { %550 = vmatmul.bf16.vlgmr.msrb.gmra.mxu2 %v470_v40 }
  0x88   :  { %555 = vmatmul.bf16.gmra.mxu2 %v471_v45 }
  0x98   :  { %560 = vmatmul.bf16.gmra.mxu2 %v472_v48 }
  0xa8   :  { %565 = vmatmul.bf16.gmra.mxu2 %v473_v51 }
  0xb5   :  { %v285_v14 = vpop.f32.mrf.mxu0 }
  0xb7   :  { %v430_v15 = vpop.f32.mrf.mxu1 }
  0xb8   :  { %570 = vmatmul.bf16.gmra.mxu2 %v474_v55  ;;  %v431_v21 = vadd.f32 %v430_v15, %v285_v14 }
  0xbb   :  { %v2211_v57 = vpop.f32.mrf.mxu2 }
  0xbc   :  { %v450_v2 = vpop.f32.mrf.mxu3 }
  0xbd   :  { %v287_v17 = vpop.f32.mrf.mxu0 }
  0xbf   :  { %v432_v19 = vpop.f32.mrf.mxu1 }
  0xc0   :  { %v433_v26 = vadd.f32 %v432_v19, %v287_v17 }
  0xc3   :  { %v2213_v61 = vpop.f32.mrf.mxu2 }
  0xc4   :  { %v452_v13 = vpop.f32.mrf.mxu3 }
  0xc5   :  { %v290_v22 = vpop.f32.mrf.mxu0 }
  0xc7   :  { %v435_v23 = vpop.f32.mrf.mxu1 }
  0xc8   :  { %575 = vmatmul.bf16.gmra.mxu2 %v475_v62  ;;  %v436_v37 = vadd.f32 %v435_v23, %v290_v22 }
  0xcb   :  { %v2215_v0 = vpop.f32.mrf.mxu2 }
  0xcd   :  { %v292_v31 = vpop.f32.mrf.mxu0 }
  0xcf   :  { %v437_v32 = vpop.f32.mrf.mxu1 }
  0xd0   :  { %v438_v41 = vadd.f32 %v437_v32, %v292_v31 }
  0xd3   :  { %v2217_v4 = vpop.f32.mrf.mxu2 }
  0xd5   :  { %v295_v39 = vpop.f32.mrf.mxu0 }
  0xd7   :  { %v440_v40 = vpop.f32.mrf.mxu1 }
  0xd8   :  { %580 = vmatmul.bf16.gmra.mxu2 %v476_v5  ;;  %v441_v52 = vadd.f32 %v440_v40, %v295_v39 }
  0xdb   :  { %v2219_v7 = vpop.f32.mrf.mxu2 }
  0xdd   :  { %v297_v48 = vpop.f32.mrf.mxu0 }
  0xdf   :  { %v442_v50 = vpop.f32.mrf.mxu1 }
  0xe0   :  { %v443_v54 = vadd.f32 %v442_v50, %v297_v48 }
  0xe3   :  { %v2221_v11 = vpop.f32.mrf.mxu2 }
  0xe5   :  { %v300_v59 = vpop.f32.mrf.mxu0 }
  0xe7   :  { %v445_v60 = vpop.f32.mrf.mxu1 }
  0xe8   :  { %585 = vmatmul.bf16.gmra.mxu2 %v477_v12  ;;  %v446_v6 = vadd.f32 %v445_v60, %v300_v59 }
  0xeb   :  { %v2223_v16 = vpop.f32.mrf.mxu2 }
  0xed   :  { %v302_v8 = vpop.f32.mrf.mxu0 }
  0xef   :  { %v447_v9 = vpop.f32.mrf.mxu1 }
  0xf0   :  { %v448_v12 = vadd.f32 %v447_v9, %v302_v8  ;;  %v1812_v9 = vld [vmem:[#allocation8 + $0x100] sm:$0xff] }
  0xf3   :  { %v2225_v18 = vpop.f32.mrf.mxu2 }
  0xfb   :  { %v551_v20 = vpop.f32.mrf.mxu2 }
  0xfc   :  { %v591_v24 = vadd.f32 %v551_v20, %v431_v21 }
  0xfe   :  { %v609_v28 = vadd.f32 %v2227_v25, %v591_v24  ;;  %v455_v24 = vpop.f32.mrf.mxu3 }
 0x100   :  { %v625_v33 = vmax.f32 %v609_v28, 0.0  ;;  %v1819_v28 = vld [vmem:[#allocation8 + $0x138] sm:$0xff] }
 0x101   :  { %854 = vmatpush.bf16.msrb.mxu0 %v1819_v28 }
 0x103   :  { %v553_v27 = vpop.f32.mrf.mxu2 }
 0x104   :  { %v592_v29 = vadd.f32 %v553_v27, %v433_v26  ;;  %v451_v26 = vadd.f32 %v450_v2, %v2211_v57  ;;  %v456_v57 = vadd.f32 %v455_v24, %v2215_v0  ;;  %v1815_v0 = vld [vmem:[#allocation8 + $0x118] sm:$0xff] }
 0x106   :  { %v610_v30 = vadd.f32 %v2227_v25, %v592_v29  ;;  %v453_v29 = vadd.f32 %v452_v13, %v2213_v61 }
 0x108   :  { %v626_v34 = vmax.f32 %v610_v30, 0.0 }
 0x10a   :  { %v657_v35 = vpack.c.bf16 %v626_v34, %v625_v33  ;;  %v457_v34 = vpop.f32.mrf.mxu3 }
 0x10b   :  { %v556_v36 = vpop.f32.mrf.mxu2 }
 0x10c   :  { %723 = vmatmul.bf16.vlgmr.msrb.gmra.mxu3 %v657_v35  ;;  %v593_v38 = vadd.f32 %v556_v36, %v436_v37  ;;  %v1818_v37 = vld [vmem:[#allocation8 + $0x130] sm:$0xff] }
 0x10d   :  { %855 = vmatpush.bf16.msrb.mxu0 %v1818_v37 }
 0x10e   :  { %v611_v43 = vadd.f32 %v2227_v25, %v593_v38 }
 0x110   :  { %v627_v46 = vmax.f32 %v611_v43, 0.0 }
 0x112   :  { %v460_v61 = vpop.f32.mrf.mxu3 }
 0x113   :  { %v558_v42 = vpop.f32.mrf.mxu2 }
 0x114   :  { %v594_v44 = vadd.f32 %v558_v42, %v438_v41  ;;  %v1817_v41 = vld [vmem:[#allocation8 + $0x128] sm:$0xff]  ;;  %v458_v42 = vadd.f32 %v457_v34, %v2217_v4  ;;  %v1814_v4 = vld [vmem:[#allocation8 + $0x110] sm:$0xff] }
 0x115   :  { %856 = vmatpush.bf16.msrb.mxu0 %v1817_v41 }
 0x116   :  { %v612_v45 = vadd.f32 %v2227_v25, %v594_v44 }
 0x118   :  { %v628_v47 = vmax.f32 %v612_v45, 0.0 }
 0x11a   :  { %v658_v49 = vpack.c.bf16 %v628_v47, %v627_v46 }
 0x11b   :  { %v561_v51 = vpop.f32.mrf.mxu2 }
 0x11c   :  { %728 = vmatmul.bf16.gmra.mxu3 %v658_v49  ;;  %v595_v53 = vadd.f32 %v561_v51, %v441_v52  ;;  %v1816_v49 = vld [vmem:[#allocation8 + $0x120] sm:$0xff]  ;;  %v462_v51 = vpop.f32.mrf.mxu3 }
 0x11d   :  { %857 = vmatpush.bf16.msrb.mxu0 %v1816_v49 }
 0x11e   :  { %v613_v56 = vadd.f32 %v2227_v25, %v595_v53  ;;  %v461_v53 = vadd.f32 %v460_v61, %v2219_v7 }
 0x120   :  { %v629_v63 = vmax.f32 %v613_v56, 0.0  ;;  %v1813_v56 = vld [vmem:[#allocation8 + $0x108] sm:$0xff] }
 0x121   :  { %858 = vmatpush.bf16.msrb.mxu0 %v1815_v0  ;;  %v1825_v0 = vld [vmem:[#allocation8 + $0x168] sm:$0xff] }
 0x123   :  { %v563_v55 = vpop.f32.mrf.mxu2 }
 0x124   :  { %v596_v58 = vadd.f32 %v563_v55, %v443_v54  ;;  %v463_v55 = vadd.f32 %v462_v51, %v2221_v11 }
 0x125   :  { %859 = vmatpush.bf16.msrb.mxu0 %v1814_v4 }
 0x126   :  { %v614_v62 = vadd.f32 %v2227_v25, %v596_v58 }
 0x128   :  { %v630_v1 = vmax.f32 %v614_v62, 0.0  ;;  %v465_v62 = vpop.f32.mrf.mxu3 }
 0x129   :  { %860 = vmatpush.bf16.msrb.mxu0 %v1813_v56  ;;  %v466_v7 = vadd.f32 %v465_v62, %v2223_v16  ;;  %v1823_v62 = vld [vmem:[#allocation8 + $0x158] sm:$0xff] }
 0x12a   :  { %v659_v3 = vpack.c.bf16 %v630_v1, %v629_v63 }
 0x12b   :  { %v566_v5 = vpop.f32.mrf.mxu2 }
 0x12c   :  { %733 = vmatmul.bf16.gmra.mxu3 %v659_v3  ;;  %v597_v10 = vadd.f32 %v566_v5, %v446_v6 }
 0x12d   :  { %861 = vmatpush.bf16.msrb.mxu0 %v1812_v9 }
 0x12e   :  { %v615_v15 = vadd.f32 %v2227_v25, %v597_v10 }
 0x130   :  { %v631_v20 = vmax.f32 %v615_v15, 0.0  ;;  %v467_v6 = vpop.f32.mrf.mxu3 }
 0x131   :  { %v468_v11 = vadd.f32 %v467_v6, %v2225_v18 }
 0x133   :  { %v568_v14 = vpop.f32.mrf.mxu2 }
 0x134   :  { %v598_v17 = vadd.f32 %v568_v14, %v448_v12 }
 0x136   :  { %v616_v19 = vadd.f32 %v2227_v25, %v598_v17 }
 0x138   :  { %v632_v21 = vmax.f32 %v616_v19, 0.0 }
 0x13a   :  { %v660_v22 = vpack.c.bf16 %v632_v21, %v631_v20  ;;  %v2253_v21 = vld [vmem:[#allocation10 + $0x1] ss:$0 sm:$0xff] }
 0x13b   :  { %v571_v23 = vpop.f32.mrf.mxu2 }
 0x13c   :  { %738 = vmatmul.bf16.gmra.mxu3 %v660_v22  ;;  %v599_v27 = vadd.f32 %v571_v23, %v451_v26 }
 0x13e   :  { %v617_v31 = vadd.f32 %v2227_v25, %v599_v27 }
 0x140   :  { %v633_v35 = vmax.f32 %v617_v31, 0.0 }
 0x143   :  { %v573_v30 = vpop.f32.mrf.mxu2 }
 0x144   :  { %v600_v32 = vadd.f32 %v573_v30, %v453_v29 }
 0x146   :  { %v618_v33 = vadd.f32 %v2227_v25, %v600_v32 }
 0x148   :  { %v634_v36 = vmax.f32 %v618_v33, 0.0 }
 0x14a   :  { %v661_v38 = vpack.c.bf16 %v634_v36, %v633_v35 }
 0x14b   :  { %v576_v39 = vpop.f32.mrf.mxu2 }
 0x14c   :  { %743 = vmatmul.bf16.gmra.mxu3 %v661_v38  ;;  %v601_v40 = vadd.f32 %v576_v39, %v456_v57 }
 0x14e   :  { %v619_v44 = vadd.f32 %v2227_v25, %v601_v40 }
 0x150   :  { %v635_v47 = vmax.f32 %v619_v44, 0.0  ;;  %v1827_v44 = vld [vmem:[#allocation8 + $0x178] sm:$0xff] }
 0x151   :  { %993 = vmatpush.bf16.msrb.mxu1 %v1827_v44 }
 0x153   :  { %v578_v43 = vpop.f32.mrf.mxu2 }
 0x154   :  { %v602_v45 = vadd.f32 %v578_v43, %v458_v42 }
 0x156   :  { %v620_v46 = vadd.f32 %v2227_v25, %v602_v45 }
 0x158   :  { %v636_v48 = vmax.f32 %v620_v46, 0.0 }
 0x15a   :  { %v662_v50 = vpack.c.bf16 %v636_v48, %v635_v47  ;;  %v1826_v47 = vld [vmem:[#allocation8 + $0x170] sm:$0xff] }
 0x15b   :  { %v581_v52 = vpop.f32.mrf.mxu2  ;;  %994 = vmatpush.bf16.msrb.mxu1 %v1826_v47 }
 0x15c   :  { %748 = vmatmul.bf16.gmra.mxu3 %v662_v50  ;;  %v603_v54 = vadd.f32 %v581_v52, %v461_v53 }
 0x15e   :  { %v621_v59 = vadd.f32 %v2227_v25, %v603_v54  ;;  %v1824_v54 = vld [vmem:[#allocation8 + $0x160] sm:$0xff] }
 0x15f   :  { %995 = vmatpush.bf16.msrb.mxu1 %v1825_v0 }
 0x160   :  { %v637_v1 = vmax.f32 %v621_v59, 0.0 }
 0x163   :  { %v583_v58 = vpop.f32.mrf.mxu2  ;;  %996 = vmatpush.bf16.msrb.mxu1 %v1824_v54 }
 0x164   :  { %v604_v60 = vadd.f32 %v583_v58, %v463_v55 }
 0x166   :  { %v622_v63 = vadd.f32 %v2227_v25, %v604_v60 }
 0x167   :  { %997 = vmatpush.bf16.msrb.mxu1 %v1823_v62 }
 0x168   :  { %v638_v2 = vmax.f32 %v622_v63, 0.0 }
 0x16a   :  { %v663_v3 = vpack.c.bf16 %v638_v2, %v637_v1  ;;  %v1822_v1 = vld [vmem:[#allocation8 + $0x150] sm:$0xff] }
 0x16b   :  { %v586_v5 = vpop.f32.mrf.mxu2  ;;  %998 = vmatpush.bf16.msrb.mxu1 %v1822_v1 }
 0x16c   :  { %753 = vmatmul.bf16.gmra.mxu3 %v663_v3  ;;  %v605_v8 = vadd.f32 %v586_v5, %v466_v7  ;;  %v1821_v3 = vld [vmem:[#allocation8 + $0x148] sm:$0xff] }
 0x16e   :  { %v623_v12 = vadd.f32 %v2227_v25, %v605_v8 }
 0x16f   :  { %999 = vmatpush.bf16.msrb.mxu1 %v1821_v3 }
 0x170   :  { %v639_v15 = vmax.f32 %v623_v12, 0.0 }
 0x173   :  { %v588_v10 = vpop.f32.mrf.mxu2 }
 0x174   :  { %v606_v13 = vadd.f32 %v588_v10, %v468_v11  ;;  %v1820_v10 = vld [vmem:[#allocation8 + $0x140] sm:$0xff] }
 0x175   :  { %1000 = vmatpush.bf16.msrb.mxu1 %v1820_v10 }
 0x176   :  { %v624_v14 = vadd.f32 %v2227_v25, %v606_v13 }
 0x178   :  { %v640_v17 = vmax.f32 %v624_v14, 0.0 }
 0x17a   :  { %v664_v19 = vpack.c.bf16 %v640_v17, %v639_v15 }
 0x17c   :  { %758 = vmatmul.bf16.gmra.mxu3 %v664_v19 }
 0x18f   :  { %v724_v20 = vpop.f32.mrf.mxu3 }
 0x190   :  { %v725_v16 = vadd.f32 %v2253_v21, %v724_v20 }
 0x192   :  { %v764_v23 = vmax.f32 %v725_v16, 0.0 }
 0x197   :  { %v726_v22 = vpop.f32.mrf.mxu3 }
 0x198   :  { %v727_v18 = vadd.f32 %v2253_v21, %v726_v22  ;;  %v1905_v22 = vld [vmem:[#allocation10 + $0x2] ss:$0 sm:$0xff] }
 0x19a   :  { %v765_v24 = vmax.f32 %v727_v18, 0.0 }
 0x19c   :  { %v796_v26 = vpack.c.bf16 %v765_v24, %v764_v23 }
 0x19e   :  { %862 = vmatmul.bf16.vlgmr.msrb.gmra.mxu0 %v796_v26 }
 0x19f   :  { %v729_v27 = vpop.f32.mrf.mxu3 }
 0x1a0   :  { %v730_v28 = vadd.f32 %v2253_v21, %v729_v27 }
 0x1a2   :  { %v766_v30 = vmax.f32 %v730_v28, 0.0 }
 0x1a7   :  { %v731_v25 = vpop.f32.mrf.mxu3 }
 0x1a8   :  { %v732_v29 = vadd.f32 %v2253_v21, %v731_v25 }
 0x1aa   :  { %v767_v31 = vmax.f32 %v732_v29, 0.0 }
 0x1ac   :  { %v797_v32 = vpack.c.bf16 %v767_v31, %v766_v30 }
 0x1ae   :  { %867 = vmatmul.bf16.gmra.mxu0 %v797_v32 }
 0x1af   :  { %v734_v33 = vpop.f32.mrf.mxu3 }
 0x1b0   :  { %v735_v34 = vadd.f32 %v2253_v21, %v734_v33 }
 0x1b2   :  { %v768_v37 = vmax.f32 %v735_v34, 0.0 }
 0x1b7   :  { %v736_v35 = vpop.f32.mrf.mxu3 }
 0x1b8   :  { %v737_v36 = vadd.f32 %v2253_v21, %v736_v35 }
 0x1ba   :  { %v769_v38 = vmax.f32 %v737_v36, 0.0 }
 0x1bc   :  { %v798_v39 = vpack.c.bf16 %v769_v38, %v768_v37 }
 0x1be   :  { %872 = vmatmul.bf16.gmra.mxu0 %v798_v39 }
 0x1bf   :  { %v739_v57 = vpop.f32.mrf.mxu3 }
 0x1c0   :  { %v740_v40 = vadd.f32 %v2253_v21, %v739_v57 }
 0x1c2   :  { %v770_v42 = vmax.f32 %v740_v40, 0.0 }
 0x1c7   :  { %v741_v41 = vpop.f32.mrf.mxu3 }
 0x1c8   :  { %v742_v61 = vadd.f32 %v2253_v21, %v741_v41 }
 0x1ca   :  { %v771_v43 = vmax.f32 %v742_v61, 0.0 }
 0x1cc   :  { %v799_v45 = vpack.c.bf16 %v771_v43, %v770_v42 }
 0x1ce   :  { %877 = vmatmul.bf16.gmra.mxu0 %v799_v45 }
 0x1cf   :  { %v744_v46 = vpop.f32.mrf.mxu3 }
 0x1d0   :  { %v745_v48 = vadd.f32 %v2253_v21, %v744_v46 }
 0x1d2   :  { %v772_v51 = vmax.f32 %v745_v48, 0.0 }
 0x1d7   :  { %v746_v49 = vpop.f32.mrf.mxu3 }
 0x1d8   :  { %v747_v50 = vadd.f32 %v2253_v21, %v746_v49 }
 0x1da   :  { %v773_v52 = vmax.f32 %v747_v50, 0.0 }
 0x1dc   :  { %v800_v53 = vpack.c.bf16 %v773_v52, %v772_v51 }
 0x1de   :  { %882 = vmatmul.bf16.gmra.mxu0 %v800_v53 }
 0x1df   :  { %v749_v4 = vpop.f32.mrf.mxu3 }
 0x1e0   :  { %v750_v55 = vadd.f32 %v2253_v21, %v749_v4 }
 0x1e2   :  { %v774_v59 = vmax.f32 %v750_v55, 0.0 }
 0x1e7   :  { %v751_v56 = vpop.f32.mrf.mxu3 }
 0x1e8   :  { %v752_v58 = vadd.f32 %v2253_v21, %v751_v56 }
 0x1ea   :  { %v775_v60 = vmax.f32 %v752_v58, 0.0 }
 0x1ec   :  { %v801_v63 = vpack.c.bf16 %v775_v60, %v774_v59 }
 0x1ee   :  { %887 = vmatmul.bf16.gmra.mxu0 %v801_v63 }
 0x1ef   :  { %v754_v2 = vpop.f32.mrf.mxu3 }
 0x1f0   :  { %v755_v5 = vadd.f32 %v2253_v21, %v754_v2 }
 0x1f2   :  { %v776_v8 = vmax.f32 %v755_v5, 0.0 }
 0x1f7   :  { %v756_v7 = vpop.f32.mrf.mxu3 }
 0x1f8   :  { %v757_v6 = vadd.f32 %v2253_v21, %v756_v7 }
 0x1fa   :  { %v777_v11 = vmax.f32 %v757_v6, 0.0 }
 0x1fc   :  { %v802_v9 = vpack.c.bf16 %v777_v11, %v776_v8 }
 0x1fe   :  { %892 = vmatmul.bf16.gmra.mxu0 %v802_v9 }
 0x1ff   :  { %v759_v12 = vpop.f32.mrf.mxu3 }
 0x200   :  { %v760_v13 = vadd.f32 %v2253_v21, %v759_v12  ;;  %v1906_v12 = vld [vmem:[#allocation10 + $0x3] ss:$0 sm:$0xff] }
 0x202   :  { %v778_v17 = vmax.f32 %v760_v13, 0.0 }
 0x207   :  { %v761_v14 = vpop.f32.mrf.mxu3 }
 0x208   :  { %v762_v15 = vadd.f32 %v2253_v21, %v761_v14 }
 0x20a   :  { %v779_v19 = vmax.f32 %v762_v15, 0.0 }
 0x20c   :  { %v803_v20 = vpack.c.bf16 %v779_v19, %v778_v17 }
 0x20e   :  { %897 = vmatmul.bf16.gmra.mxu0 %v803_v20 }
 0x21b   :  { %v863_v16 = vpop.f32.mrf.mxu0 }
 0x21c   :  { %v864_v18 = vadd.f32 %v1905_v22, %v863_v16 }
 0x21e   :  { %v903_v26 = vmax.f32 %v864_v18, 0.0 }
 0x223   :  { %v865_v23 = vpop.f32.mrf.mxu0 }
 0x224   :  { %v866_v24 = vadd.f32 %v1905_v22, %v865_v23 }
 0x226   :  { %v904_v27 = vmax.f32 %v866_v24, 0.0 }
 0x228   :  { %v935_v28 = vpack.c.bf16 %v904_v27, %v903_v26 }
 0x22a   :  { %1001 = vmatmul.bf16.vlgmr.msrb.gmra.mxu1 %v935_v28 }
 0x22b   :  { %v868_v25 = vpop.f32.mrf.mxu0 }
 0x22c   :  { %v869_v29 = vadd.f32 %v1905_v22, %v868_v25 }
 0x22e   :  { %v905_v32 = vmax.f32 %v869_v29, 0.0 }
 0x233   :  { %v870_v30 = vpop.f32.mrf.mxu0 }
 0x234   :  { %v871_v31 = vadd.f32 %v1905_v22, %v870_v30 }
 0x236   :  { %v906_v33 = vmax.f32 %v871_v31, 0.0 }
 0x238   :  { %v936_v21 = vpack.c.bf16 %v906_v33, %v905_v32 }
 0x23a   :  { %1006 = vmatmul.bf16.gmra.mxu1 %v936_v21 }
 0x23b   :  { %v873_v34 = vpop.f32.mrf.mxu0 }
 0x23c   :  { %v874_v35 = vadd.f32 %v1905_v22, %v873_v34 }
 0x23e   :  { %v907_v38 = vmax.f32 %v874_v35, 0.0 }
 0x243   :  { %v875_v36 = vpop.f32.mrf.mxu0 }
 0x244   :  { %v876_v37 = vadd.f32 %v1905_v22, %v875_v36 }
 0x246   :  { %v908_v39 = vmax.f32 %v876_v37, 0.0  ;;  %v2146_v37 = vmov 128.0  }
 0x247   :  { %1909 = vrcp.f32 %v2146_v37 }
 0x248   :  { %v937_v57 = vpack.c.bf16 %v908_v39, %v907_v38 }
 0x24a   :  { %1011 = vmatmul.bf16.gmra.mxu1 %v937_v57 }
 0x24b   :  { %v878_v40 = vpop.f32.mrf.mxu0 }
 0x24c   :  { %v879_v41 = vadd.f32 %v1905_v22, %v878_v40 }
 0x24d   :  { %v1910_v39 = vpop.eup %1909 }
 0x24e   :  { %v909_v43 = vmax.f32 %v879_v41, 0.0  ;;  %v1075_v40 = vmul.f32 128.0, %v1910_v39  ;;  %vm1079_vm0 = vweird.f32 %v1910_v39 }
 0x253   :  { %v880_v61 = vpop.f32.mrf.mxu0 }
 0x254   :  { %v881_v42 = vadd.f32 %v1905_v22, %v880_v61  ;;  %v1076_v61 = vsub.f32 1.0, %v1075_v40 }
 0x256   :  { %v910_v44 = vmax.f32 %v881_v42, 0.0 }
 0x258   :  { %v938_v45 = vpack.c.bf16 %v910_v44, %v909_v43  ;;  %v1077_v43 = vmul.f32 %v1910_v39, %v1076_v61 }
 0x25a   :  { %1016 = vmatmul.bf16.gmra.mxu1 %v938_v45  ;;  %v1078_v45 = vadd.f32 %v1910_v39, %v1077_v43 }
 0x25b   :  { %v883_v46 = vpop.f32.mrf.mxu0 }
 0x25c   :  { %v884_v47 = vadd.f32 %v1905_v22, %v883_v46 }
 0x25e   :  { %v911_v50 = vmax.f32 %v884_v47, 0.0  ;;  %v2307_v47 = vsel %vm1079_vm0, %v1910_v39, %v1078_v45 }
 0x263   :  { %v885_v48 = vpop.f32.mrf.mxu0 }
 0x264   :  { %v886_v49 = vadd.f32 %v1905_v22, %v885_v48 }
 0x266   :  { %v912_v51 = vmax.f32 %v886_v49, 0.0 }
 0x268   :  { %v939_v52 = vpack.c.bf16 %v912_v51, %v911_v50 }
 0x26a   :  { %1021 = vmatmul.bf16.gmra.mxu1 %v939_v52 }
 0x26b   :  { %v888_v0 = vpop.f32.mrf.mxu0 }
 0x26c   :  { %v889_v53 = vadd.f32 %v1905_v22, %v888_v0 }
 0x26e   :  { %v913_v55 = vmax.f32 %v889_v53, 0.0 }
 0x273   :  { %v890_v4 = vpop.f32.mrf.mxu0 }
 0x274   :  { %v891_v54 = vadd.f32 %v1905_v22, %v890_v4 }
 0x276   :  { %v914_v56 = vmax.f32 %v891_v54, 0.0 }
 0x278   :  { %v940_v58 = vpack.c.bf16 %v914_v56, %v913_v55 }
 0x27a   :  { %1026 = vmatmul.bf16.gmra.mxu1 %v940_v58 }
 0x27b   :  { %v893_v59 = vpop.f32.mrf.mxu0 }
 0x27c   :  { %v894_v60 = vadd.f32 %v1905_v22, %v893_v59 }
 0x27e   :  { %v915_v1 = vmax.f32 %v894_v60, 0.0 }
 0x283   :  { %v895_v62 = vpop.f32.mrf.mxu0 }
 0x284   :  { %v896_v63 = vadd.f32 %v1905_v22, %v895_v62 }
 0x286   :  { %v916_v2 = vmax.f32 %v896_v63, 0.0 }
 0x288   :  { %v941_v3 = vpack.c.bf16 %v916_v2, %v915_v1 }
 0x28a   :  { %1031 = vmatmul.bf16.gmra.mxu1 %v941_v3 }
 0x28b   :  { %v898_v5 = vpop.f32.mrf.mxu0 }
 0x28c   :  { %v899_v7 = vadd.f32 %v1905_v22, %v898_v5 }
 0x28e   :  { %v917_v11 = vmax.f32 %v899_v7, 0.0 }
 0x293   :  { %v900_v6 = vpop.f32.mrf.mxu0 }
 0x294   :  { %v901_v8 = vadd.f32 %v1905_v22, %v900_v6 }
 0x296   :  { %v918_v9 = vmax.f32 %v901_v8, 0.0 }
 0x298   :  { %v942_v10 = vpack.c.bf16 %v918_v9, %v917_v11 }
 0x29a   :  { %1036 = vmatmul.bf16.gmra.mxu1 %v942_v10 }
 0x2a7   :  { %v1002_v13 = vpop.f32.mrf.mxu1 }
 0x2a8   :  { %v1003_v14 = vadd.f32 %v1906_v12, %v1002_v13 }
 0x2aa   :  { %1042 = vadd.xlane.f32.xlu0 %v1003_v14 }
 0x2af   :  { %v1004_v15 = vpop.f32.mrf.mxu1 }
 0x2b0   :  { %v1005_v17 = vadd.f32 %v1906_v12, %v1004_v15 }
 0x2b2   :  { %1044 = vadd.xlane.f32.xlu0 %v1005_v17 }
 0x2b7   :  { %v1007_v19 = vpop.f32.mrf.mxu1 }
 0x2b8   :  { %v1008_v20 = vadd.f32 %v1906_v12, %v1007_v19 }
 0x2ba   :  { %1046 = vadd.xlane.f32.xlu1 %v1008_v20 }
 0x2bf   :  { %v1009_v16 = vpop.f32.mrf.mxu1 }
 0x2c0   :  { %v2271_v18 = vadd.f32 %v1906_v12, %v1009_v16 }
 0x2c2   :  { %1048 = vadd.xlane.f32.xlu1 %v2271_v18 }
 0x2c7   :  { %v1012_v22 = vpop.f32.mrf.mxu1 }
 0x2c8   :  { %v2274_v23 = vadd.f32 %v1906_v12, %v1012_v22 }
 0x2ca   :  { %1050 = vadd.xlane.f32.xlu2 %v2274_v23 }
 0x2cf   :  { %v1014_v24 = vpop.f32.mrf.mxu1 }
 0x2d0   :  { %v2277_v26 = vadd.f32 %v1906_v12, %v1014_v24 }
 0x2d2   :  { %1052 = vadd.xlane.f32.xlu2 %v2277_v26 }
 0x2d7   :  { %v1017_v27 = vpop.f32.mrf.mxu1 }
 0x2d8   :  { %v2280_v28 = vadd.f32 %v1906_v12, %v1017_v27 }
 0x2da   :  { %1054 = vadd.xlane.f32.xlu0 %v2280_v28 }
 0x2df   :  { %v1019_v25 = vpop.f32.mrf.mxu1 }
 0x2e0   :  { %v2283_v29 = vadd.f32 %v1906_v12, %v1019_v25 }
 0x2e2   :  { %1056 = vadd.xlane.f32.xlu1 %v2283_v29 }
 0x2e7   :  { %v1022_v30 = vpop.f32.mrf.mxu1 }
 0x2e8   :  { %v2286_v31 = vadd.f32 %v1906_v12, %v1022_v30 }
 0x2ea   :  { %1058 = vadd.xlane.f32.xlu2 %v2286_v31 }
 0x2ef   :  { %v1024_v32 = vpop.f32.mrf.mxu1 }
 0x2f0   :  { %v2289_v33 = vadd.f32 %v1906_v12, %v1024_v32 }
 0x2f2   :  { %1060 = vadd.xlane.f32.xlu0 %v2289_v33 }
 0x2f7   :  { %v1027_v21 = vpop.f32.mrf.mxu1 }
 0x2f8   :  { %v2292_v34 = vadd.f32 %v1906_v12, %v1027_v21 }
 0x2fa   :  { %1062 = vadd.xlane.f32.xlu1 %v2292_v34 }
 0x2ff   :  { %v1029_v35 = vpop.f32.mrf.mxu1 }
 0x300   :  { %v2295_v36 = vadd.f32 %v1906_v12, %v1029_v35 }
 0x302   :  { %1064 = vadd.xlane.f32.xlu2 %v2295_v36 }
 0x307   :  { %v1032_v38 = vpop.f32.mrf.mxu1 }
 0x308   :  { %v2298_v57 = vadd.f32 %v1906_v12, %v1032_v38 }
 0x30a   :  { %1066 = vadd.xlane.f32.xlu0 %v2298_v57 }
 0x30f   :  { %v1034_v41 = vpop.f32.mrf.mxu1 }
 0x310   :  { %v2301_v42 = vadd.f32 %v1906_v12, %v1034_v41 }
 0x312   :  { %1068 = vadd.xlane.f32.xlu1 %v2301_v42 }
 0x317   :  { %v1037_v44 = vpop.f32.mrf.mxu1 }
 0x318   :  { %v2304_v46 = vadd.f32 %v1906_v12, %v1037_v44 }
 0x31a   :  { %1070 = vadd.xlane.f32.xlu2 %v2304_v46 }
 0x31d   :  { %v1043_v48 = vpop.xlane.xlu0 %1042 }
 0x31e   :  { %v1081_v49 = vmul.f32 %v2307_v47, %v1043_v48 }
 0x31f   :  { %v1039_v50 = vpop.f32.mrf.mxu1 }
 0x320   :  { %v2310_v51 = vsub.f32 %v1003_v14, %v1081_v49  ;;  %v2312_v52 = vadd.f32 %v1906_v12, %v1039_v50 }
 0x322   :  { %1072 = vadd.xlane.f32.xlu0 %v2312_v52  ;;  %v1113_v0 = vmul.f32 %v2310_v51, %v2310_v51 }
 0x324   :  { %1129 = vadd.xlane.f32.xlu1 %v1113_v0 }
 0x325   :  { %v1045_v53 = vpop.xlane.xlu0 %1044 }
 0x326   :  { %v1082_v4 = vmul.f32 %v2307_v47, %v1045_v53 }
 0x328   :  { %v2318_v54 = vsub.f32 %v1005_v17, %v1082_v4 }
 0x32a   :  { %v1114_v55 = vmul.f32 %v2318_v54, %v2318_v54 }
 0x32c   :  { %1131 = vadd.xlane.f32.xlu2 %v1114_v55 }
 0x32d   :  { %v1047_v56 = vpop.xlane.xlu1 %1046 }
 0x32e   :  { %v1083_v58 = vmul.f32 %v2307_v47, %v1047_v56 }
 0x330   :  { %v2323_v59 = vsub.f32 %v1008_v20, %v1083_v58 }
 0x332   :  { %v1115_v60 = vmul.f32 %v2323_v59, %v2323_v59 }
 0x334   :  { %1133 = vadd.xlane.f32.xlu0 %v1115_v60 }
 0x335   :  { %v1049_v62 = vpop.xlane.xlu1 %1048 }
 0x336   :  { %v1084_v63 = vmul.f32 %v2307_v47, %v1049_v62 }
 0x338   :  { %v2329_v1 = vsub.f32 %v2271_v18, %v1084_v63 }
 0x33a   :  { %v1116_v2 = vmul.f32 %v2329_v1, %v2329_v1 }
 0x33c   :  { %1135 = vadd.xlane.f32.xlu1 %v1116_v2 }
 0x33d   :  { %v1051_v3 = vpop.xlane.xlu2 %1050 }
 0x33e   :  { %v1085_v5 = vmul.f32 %v2307_v47, %v1051_v3 }
 0x340   :  { %v2335_v7 = vsub.f32 %v2274_v23, %v1085_v5 }
 0x342   :  { %v1117_v6 = vmul.f32 %v2335_v7, %v2335_v7 }
 0x344   :  { %1137 = vadd.xlane.f32.xlu2 %v1117_v6 }
 0x345   :  { %v1053_v8 = vpop.xlane.xlu2 %1052 }
 0x346   :  { %v1086_v11 = vmul.f32 %v2307_v47, %v1053_v8 }
 0x348   :  { %v2341_v9 = vsub.f32 %v2277_v26, %v1086_v11 }
 0x34a   :  { %v1118_v10 = vmul.f32 %v2341_v9, %v2341_v9 }
 0x34c   :  { %1139 = vadd.xlane.f32.xlu0 %v1118_v10 }
 0x34d   :  { %v1055_v12 = vpop.xlane.xlu0 %1054 }
 0x34e   :  { %v1087_v13 = vmul.f32 %v2307_v47, %v1055_v12  ;;  %v2408_v12 = vld [vmem:[#allocation10 + $0x4] ss:$0 sm:$0xff] }
 0x350   :  { %v2347_v14 = vsub.f32 %v2280_v28, %v1087_v13 }
 0x352   :  { %v1119_v15 = vmul.f32 %v2347_v14, %v2347_v14 }
 0x354   :  { %1141 = vadd.xlane.f32.xlu1 %v1119_v15 }
 0x355   :  { %v1057_v17 = vpop.xlane.xlu1 %1056 }
 0x356   :  { %v1088_v19 = vmul.f32 %v2307_v47, %v1057_v17  ;;  %v2410_v17 = vld [vmem:[#allocation10 + $0x5] ss:$0 sm:$0xff] }
 0x358   :  { %v2353_v20 = vsub.f32 %v2283_v29, %v1088_v19 }
 0x35a   :  { %v1120_v16 = vmul.f32 %v2353_v20, %v2353_v20 }
 0x35c   :  { %1143 = vadd.xlane.f32.xlu2 %v1120_v16 }
 0x35d   :  { %v1059_v18 = vpop.xlane.xlu2 %1058 }
 0x35e   :  { %v1089_v22 = vmul.f32 %v2307_v47, %v1059_v18 }
 0x360   :  { %v2359_v23 = vsub.f32 %v2286_v31, %v1089_v22 }
 0x362   :  { %v1121_v24 = vmul.f32 %v2359_v23, %v2359_v23 }
 0x364   :  { %1145 = vadd.xlane.f32.xlu0 %v1121_v24 }
 0x365   :  { %v1061_v26 = vpop.xlane.xlu0 %1060 }
 0x366   :  { %v1090_v27 = vmul.f32 %v2307_v47, %v1061_v26 }
 0x368   :  { %v2365_v28 = vsub.f32 %v2289_v33, %v1090_v27 }
 0x36a   :  { %v1122_v25 = vmul.f32 %v2365_v28, %v2365_v28 }
 0x36c   :  { %1147 = vadd.xlane.f32.xlu1 %v1122_v25 }
 0x36d   :  { %v1063_v29 = vpop.xlane.xlu1 %1062 }
 0x36e   :  { %v1091_v30 = vmul.f32 %v2307_v47, %v1063_v29 }
 0x370   :  { %v2371_v31 = vsub.f32 %v2292_v34, %v1091_v30 }
 0x372   :  { %v1123_v32 = vmul.f32 %v2371_v31, %v2371_v31 }
 0x374   :  { %1149 = vadd.xlane.f32.xlu2 %v1123_v32 }
 0x375   :  { %v1065_v21 = vpop.xlane.xlu2 %1064 }
 0x376   :  { %v1092_v35 = vmul.f32 %v2307_v47, %v1065_v21  ;;  %v1943_v21 = vld [vmem:[#allocation7] sm:$0xff] }
 0x378   :  { %v2377_v33 = vsub.f32 %v2295_v36, %v1092_v35 }
 0x37a   :  { %v1124_v37 = vmul.f32 %v2377_v33, %v2377_v33 }
 0x37c   :  { %1151 = vadd.xlane.f32.xlu0 %v1124_v37 }
 0x37d   :  { %v1067_v38 = vpop.xlane.xlu0 %1066 }
 0x37e   :  { %v1093_v39 = vmul.f32 %v2307_v47, %v1067_v38 }
 0x380   :  { %v2383_v34 = vsub.f32 %v2298_v57, %v1093_v39 }
 0x382   :  { %v1125_v40 = vmul.f32 %v2383_v34, %v2383_v34 }
 0x384   :  { %1153 = vadd.xlane.f32.xlu1 %v1125_v40 }
 0x385   :  { %v1069_v41 = vpop.xlane.xlu1 %1068 }
 0x386   :  { %v1094_v61 = vmul.f32 %v2307_v47, %v1069_v41 }
 0x388   :  { %v2389_v36 = vsub.f32 %v2301_v42, %v1094_v61 }
 0x38a   :  { %v1126_v43 = vmul.f32 %v2389_v36, %v2389_v36 }
 0x38c   :  { %1155 = vadd.xlane.f32.xlu2 %v1126_v43 }
 0x38d   :  { %v1071_v44 = vpop.xlane.xlu2 %1070 }
 0x38e   :  { %v1095_v45 = vmul.f32 %v2307_v47, %v1071_v44 }
 0x390   :  { %v2395_v57 = vsub.f32 %v2304_v46, %v1095_v45 }
 0x392   :  { %v1127_v48 = vmul.f32 %v2395_v57, %v2395_v57 }
 0x394   :  { %1157 = vadd.xlane.f32.xlu0 %v1127_v48 }
 0x395   :  { %v1073_v49 = vpop.xlane.xlu0 %1072 }
 0x396   :  { %v1096_v50 = vmul.f32 %v2307_v47, %v1073_v49 }
 0x397   :  { %v1130_v0 = vpop.xlane.xlu1 %1129 }
 0x398   :  { %v2401_v42 = vsub.f32 %v2312_v52, %v1096_v50  ;;  %v1161_v53 = vmul.f32 %v1130_v0, %v2307_v47 }
 0x39a   :  { %v1177_v4 = vadd.f32 1e-05, %v1161_v53  ;;  %v1128_v55 = vmul.f32 %v2401_v42, %v2401_v42  ;;  %v1944_v53 = vld [vmem:[#allocation7 + $0x8] sm:$0xff] }
 0x39c   :  { %1911 = vrsqrt.f32 %v1177_v4  ;;  %1159 = vadd.xlane.f32.xlu1 %v1128_v55  ;;  %vm1199_vm2 = vweird.f32 %v1177_v4 }
 0x39f   :  { %v1132_v46 = vpop.xlane.xlu2 %1131 }
 0x3a0   :  { %v1162_v56 = vmul.f32 %v1132_v46, %v2307_v47 }
 0x3a2   :  { %v1912_v58 = vpop.eup %1911  ;;  %v1178_v60 = vadd.f32 1e-05, %v1162_v56 }
 0x3a3   :  { %v1194_v62 = vmul.f32 %v1912_v58, %v1177_v4  ;;  %vm1200_vm1 = vweird.f32 %v1912_v58 }
 0x3a4   :  { %1913 = vrsqrt.f32 %v1178_v60  ;;  %vm1201_vm3 = vmor %vm1199_vm2, %vm1200_vm1  ;;  %vm1209_vm5 = vweird.f32 %v1178_v60 }
 0x3a5   :  { %v1195_v63 = vmul.f32 %v1912_v58, %v1194_v62 }
 0x3a7   :  { %v1196_v2 = vmul.f32 0.5, %v1195_v63  ;;  %v1134_v3 = vpop.xlane.xlu0 %1133 }
 0x3a8   :  { %v1163_v52 = vmul.f32 %v1134_v3, %v2307_v47 }
 0x3a9   :  { %v1197_v5 = vsub.f32 1.5, %v1196_v2 }
 0x3aa   :  { %v1914_v6 = vpop.eup %1913  ;;  %v1179_v8 = vadd.f32 1e-05, %v1163_v52 }
 0x3ab   :  { %v1198_v11 = vmul.f32 %v1912_v58, %v1197_v5  ;;  %v1204_v10 = vmul.f32 %v1914_v6, %v1178_v60  ;;  %vm1210_vm4 = vweird.f32 %v1914_v6 }
 0x3ac   :  { %1915 = vrsqrt.f32 %v1179_v8  ;;  %vm1211_vm6 = vmor %vm1209_vm5, %vm1210_vm4  ;;  %vm1219_vm8 = vweird.f32 %v1179_v8 }
 0x3ad   :  { %v1202_v13 = vsel %vm1201_vm3, %v1912_v58, %v1198_v11  ;;  %v1205_v15 = vmul.f32 %v1914_v6, %v1204_v10 }
 0x3ae   :  { %v1353_v19 = vmul.f32 %v1202_v13, %v2310_v51 }
 0x3af   :  { %v1206_v16 = vmul.f32 0.5, %v1205_v15  ;;  %v1136_v18 = vpop.xlane.xlu1 %1135 }
 0x3b0   :  { %v1371_v22 = vmul.f32 %v2408_v12, %v1353_v19  ;;  %v1164_v24 = vmul.f32 %v1136_v18, %v2307_v47 }
 0x3b1   :  { %v1207_v26 = vsub.f32 1.5, %v1206_v16 }
 0x3b2   :  { %v1916_v27 = vpop.eup %1915  ;;  %v1389_v25 = vadd.f32 %v2410_v17, %v1371_v22  ;;  %v1180_v29 = vadd.f32 1e-05, %v1164_v24 }
 0x3b3   :  { %v1208_v30 = vmul.f32 %v1914_v6, %v1207_v26  ;;  %v1214_v32 = vmul.f32 %v1916_v27, %v1179_v8  ;;  %vm1220_vm7 = vweird.f32 %v1916_v27  ;;  %v1945_v8 = vld [vmem:[#allocation7 + $0x10] sm:$0xff] }
 0x3b4   :  { %v1437_v35 = vadd.f32 %v1943_v21, %v1389_v25  ;;  %1917 = vrsqrt.f32 %v1180_v29  ;;  %vm1221_vm9 = vmor %vm1219_vm8, %vm1220_vm7  ;;  %vm1229_vm11 = vweird.f32 %v1180_v29 }
 0x3b5   :  { %v1212_v51 = vsel %vm1211_vm6, %v1914_v6, %v1208_v30  ;;  %v1215_v37 = vmul.f32 %v1916_v27, %v1214_v32  ;;  %v1946_v32 = vld [vmem:[#allocation7 + $0x18] sm:$0xff] }
 0x3b6   :  { %1453 = vst [vmem:[#allocation12] sm:$0xff] %v1437_v35  ;;  %v1354_v38 = vmul.f32 %v1212_v51, %v2318_v54 }
 0x3b7   :  { %v1216_v39 = vmul.f32 0.5, %v1215_v37  ;;  %v1138_v40 = vpop.xlane.xlu2 %1137 }
 0x3b8   :  { %v1372_v41 = vmul.f32 %v2408_v12, %v1354_v38  ;;  %v1165_v61 = vmul.f32 %v1138_v40, %v2307_v47 }
 0x3b9   :  { %v1217_v43 = vsub.f32 1.5, %v1216_v39 }
 0x3ba   :  { %v1918_v44 = vpop.eup %1917  ;;  %v1390_v45 = vadd.f32 %v2410_v17, %v1372_v41  ;;  %v1181_v48 = vadd.f32 1e-05, %v1165_v61 }
 0x3bb   :  { %v1218_v49 = vmul.f32 %v1916_v27, %v1217_v43  ;;  %v1224_v50 = vmul.f32 %v1918_v44, %v1180_v29  ;;  %vm1230_vm10 = vweird.f32 %v1918_v44 }
 0x3bc   :  { %v1831_v0 = vpack.c.bf16 %v1390_v45, %v1389_v25  ;;  %v1438_v4 = vadd.f32 %v1944_v53, %v1390_v45  ;;  %1919 = vrsqrt.f32 %v1181_v48  ;;  %vm1231_vm12 = vmor %vm1229_vm11, %vm1230_vm10  ;;  %vm1239_vm14 = vweird.f32 %v1181_v48 }
 0x3bd   :  { %v1222_v54 = vsel %vm1221_vm9, %v1916_v27, %v1218_v49  ;;  %v1225_v55 = vmul.f32 %v1918_v44, %v1224_v50  ;;  %v1947_v49 = vld [vmem:[#allocation7 + $0x20] sm:$0xff] }
 0x3be   :  { %1832 = vst [vmem:[#allocation11] sm:$0xff] %v1831_v0   ;;  %v1355_v46 = vmul.f32 %v1222_v54, %v2323_v59 }
 0x3bf   :  { %1454 = vst [vmem:[#allocation12 + $0x8] sm:$0xff] %v1438_v4  ;;  %v1226_v56 = vmul.f32 0.5, %v1225_v55  ;;  %v1140_v58 = vpop.xlane.xlu0 %1139 }
 0x3c0   :  { %v1373_v60 = vmul.f32 %v2408_v12, %v1355_v46  ;;  %v1166_v62 = vmul.f32 %v1140_v58, %v2307_v47 }
 0x3c1   :  { %v1227_v63 = vsub.f32 1.5, %v1226_v56 }
 0x3c2   :  { %v1920_v2 = vpop.eup %1919  ;;  %v1391_v3 = vadd.f32 %v2410_v17, %v1373_v60  ;;  %v1182_v52 = vadd.f32 1e-05, %v1166_v62 }
 0x3c3   :  { %v1228_v5 = vmul.f32 %v1918_v44, %v1227_v63  ;;  %v1234_v6 = vmul.f32 %v1920_v2, %v1181_v48  ;;  %vm1240_vm13 = vweird.f32 %v1920_v2 }
 0x3c4   :  { %v1439_v11 = vadd.f32 %v1945_v8, %v1391_v3  ;;  %1921 = vrsqrt.f32 %v1182_v52  ;;  %vm1241_vm15 = vmor %vm1239_vm14, %vm1240_vm13  ;;  %vm1249_vm1 = vweird.f32 %v1182_v52 }
 0x3c5   :  { %v1232_v59 = vsel %vm1231_vm12, %v1918_v44, %v1228_v5  ;;  %v1235_v10 = vmul.f32 %v1920_v2, %v1234_v6 }
 0x3c6   :  { %1455 = vst [vmem:[#allocation12 + $0x10] sm:$0xff] %v1439_v11  ;;  %v1356_v13 = vmul.f32 %v1232_v59, %v2329_v1 }
 0x3c7   :  { %v1236_v15 = vmul.f32 0.5, %v1235_v10  ;;  %v1142_v19 = vpop.xlane.xlu1 %1141 }
 0x3c8   :  { %v1374_v16 = vmul.f32 %v2408_v12, %v1356_v13  ;;  %v1167_v18 = vmul.f32 %v1142_v19, %v2307_v47 }
 0x3c9   :  { %v1237_v22 = vsub.f32 1.5, %v1236_v15 }
 0x3ca   :  { %v1922_v24 = vpop.eup %1921  ;;  %v1392_v26 = vadd.f32 %v2410_v17, %v1374_v16  ;;  %v1183_v27 = vadd.f32 1e-05, %v1167_v18 }
 0x3cb   :  { %v1238_v25 = vmul.f32 %v1920_v2, %v1237_v22  ;;  %v1244_v29 = vmul.f32 %v1922_v24, %v1182_v52  ;;  %vm1250_vm0 = vweird.f32 %v1922_v24  ;;  %v1948_v52 = vld [vmem:[#allocation7 + $0x28] sm:$0xff] }
 0x3cc   :  { %v1836_v30 = vpack.c.bf16 %v1392_v26, %v1391_v3  ;;  %v1440_v21 = vadd.f32 %v1946_v32, %v1392_v26  ;;  %1923 = vrsqrt.f32 %v1183_v27  ;;  %vm1251_vm2 = vmor %vm1249_vm1, %vm1250_vm0  ;;  %vm1259_vm4 = vweird.f32 %v1183_v27  ;;  %v1949_v26 = vld [vmem:[#allocation7 + $0x30] sm:$0xff] }
 0x3cd   :  { %v1242_v1 = vsel %vm1241_vm15, %v1920_v2, %v1238_v25  ;;  %v1245_v35 = vmul.f32 %v1922_v24, %v1244_v29 }
 0x3ce   :  { %1868 = vst [vmem:[#allocation11 + $0x8] sm:$0xff] %v1836_v30   ;;  %v1357_v51 = vmul.f32 %v1242_v1, %v2335_v7 }
 0x3cf   :  { %1456 = vst [vmem:[#allocation12 + $0x18] sm:$0xff] %v1440_v21  ;;  %v1246_v37 = vmul.f32 0.5, %v1245_v35  ;;  %v1144_v38 = vpop.xlane.xlu2 %1143 }
 0x3d0   :  { %v1375_v39 = vmul.f32 %v2408_v12, %v1357_v51  ;;  %v1168_v40 = vmul.f32 %v1144_v38, %v2307_v47 }
 0x3d1   :  { %v1247_v41 = vsub.f32 1.5, %v1246_v37 }
 0x3d2   :  { %v1924_v61 = vpop.eup %1923  ;;  %v1393_v43 = vadd.f32 %v2410_v17, %v1375_v39  ;;  %v1184_v44 = vadd.f32 1e-05, %v1168_v40 }
 0x3d3   :  { %v1248_v45 = vmul.f32 %v1922_v24, %v1247_v41  ;;  %v1254_v48 = vmul.f32 %v1924_v61, %v1183_v27  ;;  %vm1260_vm3 = vweird.f32 %v1924_v61 }
 0x3d4   :  { %v1441_v50 = vadd.f32 %v1947_v49, %v1393_v43  ;;  %1925 = vrsqrt.f32 %v1184_v44  ;;  %vm1261_vm5 = vmor %vm1259_vm4, %vm1260_vm3  ;;  %vm1269_vm7 = vweird.f32 %v1184_v44 }
 0x3d5   :  { %v1252_v7 = vsel %vm1251_vm2, %v1922_v24, %v1248_v45  ;;  %v1255_v0 = vmul.f32 %v1924_v61, %v1254_v48 }
 0x3d6   :  { %1457 = vst [vmem:[#allocation12 + $0x20] sm:$0xff] %v1441_v50  ;;  %v1358_v53 = vmul.f32 %v1252_v7, %v2341_v9 }
 0x3d7   :  { %v1256_v4 = vmul.f32 0.5, %v1255_v0  ;;  %v1146_v54 = vpop.xlane.xlu0 %1145 }
 0x3d8   :  { %v1376_v55 = vmul.f32 %v2408_v12, %v1358_v53  ;;  %v1169_v46 = vmul.f32 %v1146_v54, %v2307_v47 }
 0x3d9   :  { %v1257_v56 = vsub.f32 1.5, %v1256_v4 }
 0x3da   :  { %v1926_v58 = vpop.eup %1925  ;;  %v1394_v60 = vadd.f32 %v2410_v17, %v1376_v55  ;;  %v1185_v62 = vadd.f32 1e-05, %v1169_v46 }
 0x3db   :  { %v1258_v63 = vmul.f32 %v1924_v61, %v1257_v56  ;;  %v1264_v2 = vmul.f32 %v1926_v58, %v1184_v44  ;;  %vm1270_vm6 = vweird.f32 %v1926_v58  ;;  %v1951_v56 = vld [vmem:[#allocation7 + $0x40] sm:$0xff] }
 0x3dc   :  { %v1841_v3 = vpack.c.bf16 %v1394_v60, %v1393_v43  ;;  %v1442_v5 = vadd.f32 %v1948_v52, %v1394_v60  ;;  %1927 = vrsqrt.f32 %v1185_v62  ;;  %vm1271_vm8 = vmor %vm1269_vm7, %vm1270_vm6  ;;  %vm1279_vm10 = vweird.f32 %v1185_v62 }
 0x3dd   :  { %v1262_v9 = vsel %vm1261_vm5, %v1924_v61, %v1258_v63  ;;  %v1265_v6 = vmul.f32 %v1926_v58, %v1264_v2  ;;  %v1950_v61 = vld [vmem:[#allocation7 + $0x38] sm:$0xff] }
 0x3de   :  { %1869 = vst [vmem:[#allocation11 + $0x10] sm:$0xff] %v1841_v3   ;;  %v1359_v8 = vmul.f32 %v1262_v9, %v2347_v14 }
 0x3df   :  { %1458 = vst [vmem:[#allocation12 + $0x28] sm:$0xff] %v1442_v5  ;;  %v1266_v11 = vmul.f32 0.5, %v1265_v6  ;;  %v1148_v59 = vpop.xlane.xlu1 %1147 }
 0x3e0   :  { %v1377_v10 = vmul.f32 %v2408_v12, %v1359_v8  ;;  %v1170_v13 = vmul.f32 %v1148_v59, %v2307_v47 }
 0x3e1   :  { %v1267_v15 = vsub.f32 1.5, %v1266_v11 }
 0x3e2   :  { %v1928_v19 = vpop.eup %1927  ;;  %v1395_v16 = vadd.f32 %v2410_v17, %v1377_v10  ;;  %v1186_v18 = vadd.f32 1e-05, %v1170_v13  ;;  %v1952_v13 = vld [vmem:[#allocation7 + $0x48] sm:$0xff] }
 0x3e3   :  { %v1268_v22 = vmul.f32 %v1926_v58, %v1267_v15  ;;  %v1274_v24 = vmul.f32 %v1928_v19, %v1185_v62  ;;  %vm1280_vm9 = vweird.f32 %v1928_v19 }
 0x3e4   :  { %v1443_v27 = vadd.f32 %v1949_v26, %v1395_v16  ;;  %1929 = vrsqrt.f32 %v1186_v18  ;;  %vm1281_vm11 = vmor %vm1279_vm10, %vm1280_vm9  ;;  %vm1289_vm13 = vweird.f32 %v1186_v18 }
 0x3e5   :  { %v1272_v14 = vsel %vm1271_vm8, %v1926_v58, %v1268_v22  ;;  %v1275_v25 = vmul.f32 %v1928_v19, %v1274_v24 }
 0x3e6   :  { %1459 = vst [vmem:[#allocation12 + $0x30] sm:$0xff] %v1443_v27  ;;  %v1360_v29 = vmul.f32 %v1272_v14, %v2353_v20 }
 0x3e7   :  { %v1276_v30 = vmul.f32 0.5, %v1275_v25  ;;  %v1150_v32 = vpop.xlane.xlu2 %1149 }
 0x3e8   :  { %v1378_v21 = vmul.f32 %v2408_v12, %v1360_v29  ;;  %v1171_v1 = vmul.f32 %v1150_v32, %v2307_v47 }
 0x3e9   :  { %v1277_v35 = vsub.f32 1.5, %v1276_v30 }
 0x3ea   :  { %v1930_v51 = vpop.eup %1929  ;;  %v1396_v37 = vadd.f32 %v2410_v17, %v1378_v21  ;;  %v1187_v38 = vadd.f32 1e-05, %v1171_v1  ;;  %v1953_v21 = vld [vmem:[#allocation7 + $0x50] sm:$0xff] }
 0x3eb   :  { %v1278_v39 = vmul.f32 %v1928_v19, %v1277_v35  ;;  %v1284_v40 = vmul.f32 %v1930_v51, %v1186_v18  ;;  %vm1290_vm12 = vweird.f32 %v1930_v51 }
 0x3ec   :  { %v1846_v41 = vpack.c.bf16 %v1396_v37, %v1395_v16  ;;  %v1444_v43 = vadd.f32 %v1950_v61, %v1396_v37  ;;  %1931 = vrsqrt.f32 %v1187_v38  ;;  %vm1291_vm14 = vmor %vm1289_vm13, %vm1290_vm12  ;;  %vm1299_vm0 = vweird.f32 %v1187_v38 }
 0x3ed   :  { %v1282_v20 = vsel %vm1281_vm11, %v1928_v19, %v1278_v39  ;;  %v1285_v44 = vmul.f32 %v1930_v51, %v1284_v40 }
 0x3ee   :  { %1870 = vst [vmem:[#allocation11 + $0x18] sm:$0xff] %v1846_v41   ;;  %v1361_v45 = vmul.f32 %v1282_v20, %v2359_v23 }
 0x3ef   :  { %1460 = vst [vmem:[#allocation12 + $0x38] sm:$0xff] %v1444_v43  ;;  %v1286_v48 = vmul.f32 0.5, %v1285_v44  ;;  %v1152_v49 = vpop.xlane.xlu0 %1151 }
 0x3f0   :  { %v1379_v50 = vmul.f32 %v2408_v12, %v1361_v45  ;;  %v1172_v7 = vmul.f32 %v1152_v49, %v2307_v47  ;;  %v1954_v49 = vld [vmem:[#allocation7 + $0x58] sm:$0xff] }
 0x3f1   :  { %v1287_v0 = vsub.f32 1.5, %v1286_v48 }
 0x3f2   :  { %v1932_v53 = vpop.eup %1931  ;;  %v1397_v4 = vadd.f32 %v2410_v17, %v1379_v50  ;;  %v1188_v54 = vadd.f32 1e-05, %v1172_v7 }
 0x3f3   :  { %v1288_v55 = vmul.f32 %v1930_v51, %v1287_v0  ;;  %v1294_v46 = vmul.f32 %v1932_v53, %v1187_v38  ;;  %vm1300_vm15 = vweird.f32 %v1932_v53 }
 0x3f4   :  { %v1445_v58 = vadd.f32 %v1951_v56, %v1397_v4  ;;  %1933 = vrsqrt.f32 %v1188_v54  ;;  %vm1301_vm1 = vmor %vm1299_vm0, %vm1300_vm15  ;;  %vm1309_vm3 = vweird.f32 %v1188_v54 }
 0x3f5   :  { %v1292_v23 = vsel %vm1291_vm14, %v1930_v51, %v1288_v55  ;;  %v1295_v60 = vmul.f32 %v1932_v53, %v1294_v46 }
 0x3f6   :  { %1461 = vst [vmem:[#allocation12 + $0x40] sm:$0xff] %v1445_v58  ;;  %v1362_v62 = vmul.f32 %v1292_v23, %v2365_v28 }
 0x3f7   :  { %v1296_v63 = vmul.f32 0.5, %v1295_v60  ;;  %v1154_v2 = vpop.xlane.xlu1 %1153 }
 0x3f8   :  { %v1380_v3 = vmul.f32 %v2408_v12, %v1362_v62  ;;  %v1173_v52 = vmul.f32 %v1154_v2, %v2307_v47 }
 0x3f9   :  { %v1297_v5 = vsub.f32 1.5, %v1296_v63  ;;  %v1955_v63 = vld [vmem:[#allocation7 + $0x60] sm:$0xff] }
 0x3fa   :  { %v1934_v9 = vpop.eup %1933  ;;  %v1398_v6 = vadd.f32 %v2410_v17, %v1380_v3  ;;  %v1189_v8 = vadd.f32 1e-05, %v1173_v52 }
 0x3fb   :  { %v1298_v11 = vmul.f32 %v1932_v53, %v1297_v5  ;;  %v1304_v59 = vmul.f32 %v1934_v9, %v1188_v54  ;;  %vm1310_vm2 = vweird.f32 %v1934_v9 }
 0x3fc   :  { %v1851_v10 = vpack.c.bf16 %v1398_v6, %v1397_v4  ;;  %v1446_v15 = vadd.f32 %v1952_v13, %v1398_v6  ;;  %1935 = vrsqrt.f32 %v1189_v8  ;;  %vm1311_vm4 = vmor %vm1309_vm3, %vm1310_vm2  ;;  %vm1319_vm6 = vweird.f32 %v1189_v8  ;;  %v1956_v13 = vld [vmem:[#allocation7 + $0x68] sm:$0xff] }
 0x3fd   :  { %v1302_v28 = vsel %vm1301_vm1, %v1932_v53, %v1298_v11  ;;  %v1305_v19 = vmul.f32 %v1934_v9, %v1304_v59 }
 0x3fe   :  { %1871 = vst [vmem:[#allocation11 + $0x20] sm:$0xff] %v1851_v10   ;;  %v1363_v16 = vmul.f32 %v1302_v28, %v2371_v31 }
 0x3ff   :  { %1462 = vst [vmem:[#allocation12 + $0x48] sm:$0xff] %v1446_v15  ;;  %v1306_v18 = vmul.f32 0.5, %v1305_v19  ;;  %v1156_v22 = vpop.xlane.xlu2 %1155 }
 0x400   :  { %v1381_v24 = vmul.f32 %v2408_v12, %v1363_v16  ;;  %v1174_v26 = vmul.f32 %v1156_v22, %v2307_v47 }
 0x401   :  { %v1307_v27 = vsub.f32 1.5, %v1306_v18 }
 0x402   :  { %v1936_v14 = vpop.eup %1935  ;;  %v1399_v25 = vadd.f32 %v2410_v17, %v1381_v24  ;;  %v1190_v29 = vadd.f32 1e-05, %v1174_v26 }
 0x403   :  { %v1308_v30 = vmul.f32 %v1934_v9, %v1307_v27  ;;  %v1314_v32 = vmul.f32 %v1936_v14, %v1189_v8  ;;  %vm1320_vm5 = vweird.f32 %v1936_v14  ;;  %v1957_v27 = vld [vmem:[#allocation7 + $0x70] sm:$0xff] }
 0x404   :  { %v1447_v1 = vadd.f32 %v1953_v21, %v1399_v25  ;;  %1937 = vrsqrt.f32 %v1190_v29  ;;  %vm1321_vm7 = vmor %vm1319_vm6, %vm1320_vm5  ;;  %vm1329_vm9 = vweird.f32 %v1190_v29  ;;  %v1958_v21 = vld [vmem:[#allocation7 + $0x78] sm:$0xff] }
 0x405   :  { %v1312_v31 = vsel %vm1311_vm4, %v1934_v9, %v1308_v30  ;;  %v1315_v35 = vmul.f32 %v1936_v14, %v1314_v32 }
 0x406   :  { %1463 = vst [vmem:[#allocation12 + $0x50] sm:$0xff] %v1447_v1  ;;  %v1364_v51 = vmul.f32 %v1312_v31, %v2377_v33 }
 0x407   :  { %v1316_v37 = vmul.f32 0.5, %v1315_v35  ;;  %v1158_v38 = vpop.xlane.xlu0 %1157 }
 0x408   :  { %v1382_v39 = vmul.f32 %v2408_v12, %v1364_v51  ;;  %v1175_v40 = vmul.f32 %v1158_v38, %v2307_v47 }
 0x409   :  { %v1317_v41 = vsub.f32 1.5, %v1316_v37 }
 0x40a   :  { %v1938_v61 = vpop.eup %1937  ;;  %v1400_v43 = vadd.f32 %v2410_v17, %v1382_v39  ;;  %v1191_v20 = vadd.f32 1e-05, %v1175_v40 }
 0x40b   :  { %v1318_v44 = vmul.f32 %v1936_v14, %v1317_v41  ;;  %v1324_v45 = vmul.f32 %v1938_v61, %v1190_v29  ;;  %vm1330_vm8 = vweird.f32 %v1938_v61 }
 0x40c   :  { %v1856_v48 = vpack.c.bf16 %v1400_v43, %v1399_v25  ;;  %v1448_v50 = vadd.f32 %v1954_v49, %v1400_v43  ;;  %1939 = vrsqrt.f32 %v1191_v20  ;;  %vm1331_vm10 = vmor %vm1329_vm9, %vm1330_vm8  ;;  %vm1339_vm12 = vweird.f32 %v1191_v20 }
 0x40d   :  { %v1322_v33 = vsel %vm1321_vm7, %v1936_v14, %v1318_v44  ;;  %v1325_v7 = vmul.f32 %v1938_v61, %v1324_v45 }
 0x40e   :  { %1872 = vst [vmem:[#allocation11 + $0x28] sm:$0xff] %v1856_v48   ;;  %v1365_v0 = vmul.f32 %v1322_v33, %v2383_v34 }
 0x40f   :  { %1464 = vst [vmem:[#allocation12 + $0x58] sm:$0xff] %v1448_v50  ;;  %v1326_v53 = vmul.f32 0.5, %v1325_v7  ;;  %v1160_v4 = vpop.xlane.xlu1 %1159 }
 0x410   :  { %v1383_v54 = vmul.f32 %v2408_v12, %v1365_v0  ;;  %v1176_v55 = vmul.f32 %v1160_v4, %v2307_v47 }
 0x411   :  { %v1327_v46 = vsub.f32 1.5, %v1326_v53 }
 0x412   :  { %v1940_v56 = vpop.eup %1939  ;;  %v1401_v58 = vadd.f32 %v2410_v17, %v1383_v54  ;;  %v1192_v23 = vadd.f32 1e-05, %v1176_v55 }
 0x413   :  { %v1328_v60 = vmul.f32 %v1938_v61, %v1327_v46  ;;  %v1334_v62 = vmul.f32 %v1940_v56, %v1191_v20  ;;  %vm1340_vm11 = vweird.f32 %v1940_v56 }
 0x414   :  { %v1449_v2 = vadd.f32 %v1955_v63, %v1401_v58  ;;  %1941 = vrsqrt.f32 %v1192_v23  ;;  %vm1341_vm13 = vmor %vm1339_vm12, %vm1340_vm11  ;;  %vm1349_vm15 = vweird.f32 %v1192_v23 }
 0x415   :  { %v1332_v34 = vsel %vm1331_vm10, %v1938_v61, %v1328_v60  ;;  %v1335_v3 = vmul.f32 %v1940_v56, %v1334_v62 }
 0x416   :  { %1465 = vst [vmem:[#allocation12 + $0x60] sm:$0xff] %v1449_v2  ;;  %v1366_v52 = vmul.f32 %v1332_v34, %v2389_v36 }
 0x417   :  { %v1336_v5 = vmul.f32 0.5, %v1335_v3 }
 0x418   :  { %v1384_v47 = vmul.f32 %v2408_v12, %v1366_v52 }
 0x419   :  { %v1337_v9 = vsub.f32 1.5, %v1336_v5 }
 0x41a   :  { %v1942_v6 = vpop.eup %1941  ;;  %v1402_v8 = vadd.f32 %v2410_v17, %v1384_v47 }
 0x41b   :  { %v1338_v11 = vmul.f32 %v1940_v56, %v1337_v9  ;;  %v1344_v59 = vmul.f32 %v1942_v6, %v1192_v23  ;;  %vm1350_vm14 = vweird.f32 %v1942_v6 }
 0x41c   :  { %v1861_v10 = vpack.c.bf16 %v1402_v8, %v1401_v58  ;;  %v1450_v15 = vadd.f32 %v1956_v13, %v1402_v8  ;;  %vm1351_vm0 = vmor %vm1349_vm15, %vm1350_vm14 }
 0x41d   :  { %v1342_v28 = vsel %vm1341_vm13, %v1940_v56, %v1338_v11  ;;  %v1345_v19 = vmul.f32 %v1942_v6, %v1344_v59 }
 0x41e   :  { %1873 = vst [vmem:[#allocation11 + $0x30] sm:$0xff] %v1861_v10   ;;  %v1367_v36 = vmul.f32 %v1342_v28, %v2395_v57 }
 0x41f   :  { %1466 = vst [vmem:[#allocation12 + $0x68] sm:$0xff] %v1450_v15  ;;  %v1346_v16 = vmul.f32 0.5, %v1345_v19 }
 0x420   :  { %v1385_v18 = vmul.f32 %v2408_v12, %v1367_v36 }
 0x421   :  { %v1347_v22 = vsub.f32 1.5, %v1346_v16 }
 0x422   :  { %v1403_v24 = vadd.f32 %v2410_v17, %v1385_v18 }
 0x423   :  { %v1348_v26 = vmul.f32 %v1942_v6, %v1347_v22 }
 0x424   :  { %v1451_v14 = vadd.f32 %v1957_v27, %v1403_v24 }
 0x425   :  { %v1352_v25 = vsel %vm1351_vm0, %v1942_v6, %v1348_v26 }
 0x426   :  { %1467 = vst [vmem:[#allocation12 + $0x70] sm:$0xff] %v1451_v14  ;;  %v1368_v29 = vmul.f32 %v1352_v25, %v2401_v42 }
 0x428   :  { %v1386_v30 = vmul.f32 %v2408_v12, %v1368_v29 }
 0x42a   :  { %v1404_v57 = vadd.f32 %v2410_v17, %v1386_v30 }
 0x42c   :  { %v1866_v32 = vpack.c.bf16 %v1404_v57, %v1403_v24  ;;  %v1452_v1 = vadd.f32 %v1958_v21, %v1404_v57 }
 0x42e   :  { %1874 = vst [vmem:[#allocation11 + $0x38] sm:$0xff] %v1866_v32  }
 0x42f   :  { %1468 = vst [vmem:[#allocation12 + $0x78] sm:$0xff] %v1452_v1  ;;  %1481 = dma.vmem_to_hbm [thread:$0]  %s1474_s22, 1024, %s1476_s25, [#allocation4], %s2138_s29, %s2138_s29, %s2139_s30  }
 0x430   :  { %1494 = dma.vmem_to_hbm [thread:$0]  %s1487_s27, 2048, %s1489_s8, [#allocation13], %s2143_s16, %s2143_s16, %s2144_s17  }
 0x431   :  { %2133 = dma.done.wait [#allocation4], 1024  }
 0x432   :  { %2134 = vsyncadd [#allocation4], 4294966272 }
 0x433   :  { %2135 = dma.done.wait [#allocation13], 2048  }
 0x434   :  { %2136 = vsyncadd [#allocation13], 4294965248 }
 0x435   :  { %1503 = vsyncpa [#allocation3], 1 }
 0x436   :  { %1504 = vsyncpa [#allocation6], 1 }
 0x437   :  { %1505 = vsyncpa [#allocation9], 1 }
 0x438   :  { %1506 = vsyncpa [#allocation4], 1 }
 0x439   :  { %1507 = vsyncpa [#allocation13], 1 }

</bundles_post_ra>
